<compile_context>
chip_gen: v7x
topology: tpu7x:2x2x1
jax: 0.10.0
libtpu: 0.0.40
codegen_flags: <defaults>
</compile_context>

<pallas_src>
import jax
import jax.numpy as jnp
from jax import lax
from jax.experimental import pallas as pl
from jax.experimental.pallas import tpu as pltpu


# ----------------------------------------------------------------------------
# Chip introspection (VMEM capacity, #TensorCores) and derived budgets.
# ----------------------------------------------------------------------------
_CHIP = None


def _chip():
    """Returns (vmem_capacity_bytes, num_tensorcores_per_chip)."""
    global _CHIP
    if _CHIP is None:
        vmem = 64 * 1024 * 1024          # conservative default (v7x-sized)
        n_tc = 1
        try:
            kind = jax.devices()[0].device_kind.lower()
            if ("v5" in kind) or ("v6" in kind):
                vmem = 128 * 1024 * 1024
            if "v7" in kind:
                vmem = 64 * 1024 * 1024
                n_tc = 2                 # only v7x has 2 TCs/chip
        except Exception:
            pass
        try:
            info = pltpu.get_tpu_info()
            vmem = int(getattr(info, "vmem_capacity_bytes", vmem))
        except Exception:
            pass
        _CHIP = (vmem, n_tc)
    return _CHIP


def _vmem_limit():
    cap, _ = _chip()
    return min(int(cap * 0.65), 96 * 1024 * 1024)


def _probe_single_buffer():
    """Check (eagerly, outside any jit trace) that pipeline_mode=pl.Buffered(1)
    compiles on this runtime; fall back to default double-buffering otherwise."""
    try:
        def _copy(x_ref, o_ref):
            o_ref[...] = x_ref[...]
        f = pl.pallas_call(
            _copy,
            out_shape=jax.ShapeDtypeStruct((8, 128), jnp.float32),
            grid=(2,),
            in_specs=[pl.BlockSpec((8, 128), lambda i: (0, 0),
                                   pipeline_mode=pl.Buffered(1))],
            out_specs=pl.BlockSpec((8, 128), lambda i: (0, 0)),
        )
        jax.block_until_ready(f(jnp.zeros((8, 128), jnp.float32)))
        return True
    except Exception:
        return False


_SINGLE_BUFFER = _probe_single_buffer()


# ----------------------------------------------------------------------------
# Tiling helpers.
# ----------------------------------------------------------------------------
def _round_up(n, m):
    return (n + m - 1) // m * m


def _tile_and_pad(dim, candidates, max_full=512):
    """Return (padded_dim, tile). Small dims stay a single full-extent block; large
    dims that don't divide any candidate are padded to a 128-multiple so a dense
    tile exists (keeps the 2-deep pipeline, avoids one huge VMEM block)."""
    if dim <= max_full:
        return dim, dim
    for c in candidates:
        if dim % c == 0:
            return dim, c
    pad = _round_up(dim, 128)
    for c in candidates:
        if pad % c == 0:
            return pad, c
    return pad, 128


# ----------------------------------------------------------------------------
# Tiled matmul + bias kernel (hoisted GRU input projection).
# K is kept un-tiled (fine at these sizes; add a K axis + accumulator for huge K).
# ----------------------------------------------------------------------------
def matmul_bias_kernel(x_ref, w_ref, b_ref, o_ref):
    acc = jnp.dot(x_ref[...], w_ref[...], preferred_element_type=jnp.float32)
    o_ref[...] = (acc + b_ref[...]).astype(o_ref.dtype)


def matmul_bias(x, w, b, out_dtype=jnp.float32):
    """x: (M, K) bf16, w: (K, N) bf16, b: (1, N) f32 -> (M, N) out_dtype."""
    M, K = x.shape
    N = w.shape[-1]
    Mp, tm = _tile_and_pad(M, (1024, 512, 256, 128))
    Np, tn = _tile_and_pad(N, (512, 256, 128))
    if Mp != M:
        x = jnp.pad(x, ((0, Mp - M), (0, 0)))
    if Np != N:
        w = jnp.pad(w, ((0, 0), (0, Np - N)))
        b = jnp.pad(b, ((0, 0), (0, Np - N)))
    out = pl.pallas_call(
        matmul_bias_kernel,
        out_shape=jax.ShapeDtypeStruct((Mp, Np), out_dtype),
        grid_spec=pltpu.PrefetchScalarGridSpec(
            num_scalar_prefetch=0,
            grid=(Mp // tm, Np // tn),
            in_specs=[pl.BlockSpec((tm, K), lambda i, j: (i, 0)),
                      pl.BlockSpec((K, tn), lambda i, j: (0, j)),
                      pl.BlockSpec((1, tn), lambda i, j: (0, j))],
            out_specs=pl.BlockSpec((tm, tn), lambda i, j: (i, j))),
        compiler_params=pltpu.CompilerParams(
            dimension_semantics=("parallel", "parallel"),
            vmem_limit_bytes=_vmem_limit()),
    )(x, w, b)
    if Mp != M or Np != N:
        out = out[:M, :N]
    return out


# ----------------------------------------------------------------------------
# Dense head: (T, B, H) seq-major hidden states -> (B, T, V) logits, with the
# (T,B,*)->(B,T,*) permute fused into the BlockSpecs (each grid step reads a
# seq-major (tt, tb, H) tile and writes a batch-major (tb, tt, tn) logits block),
# so the H-wide activation never round-trips HBM just to relayout it.
# ----------------------------------------------------------------------------
def dense_head_kernel(y_ref, w_ref, b_ref, o_ref):
    # y_ref: (tt, tb, H) seq-major; o_ref: (tb, tt, tn) batch-major.
    w = w_ref[...]
    bias = b_ref[...].astype(jnp.float32)
    tb = o_ref.shape[0]
    for i in range(tb):                    # static, small (<= 8 rows) unrolled loop
        acc = jnp.dot(y_ref[:, i, :], w, preferred_element_type=jnp.float32) + bias
        o_ref[i] = acc.astype(o_ref.dtype)


def dense_head(y, w, b, out_dtype=jnp.float32):
    """y: (T, B, H) bf16 seq-major; w: (H, V) bf16; b: (1, V) f32 -> (B, T, V)."""
    T, B, H = y.shape
    V = w.shape[-1]
    vmem_cap, _ = _chip()
    Vp, tn = _tile_and_pad(V, (512, 256, 128))
    if Vp != V:
        w = jnp.pad(w, ((0, 0), (0, Vp - V)))
        b = jnp.pad(b, ((0, 0), (0, Vp - V)))
    tb = 8 if B % 8 == 0 else B            # small batch block per grid step
    cands = [c for c in (256, 128, 64, 32, 16, 8) if T % c == 0]
    budget = int(vmem_cap * 0.4)
    tt = None
    for c in cands:
        blk = 2 * (c * tb * H * 2 + tb * c * tn * 4) + H * tn * 2
        if blk <= budget:
            tt = c
            break
    if tt is None:
        tt = cands[-1] if cands else T

    out = pl.pallas_call(
        dense_head_kernel,
        out_shape=jax.ShapeDtypeStruct((B, T, Vp), out_dtype),
        grid_spec=pltpu.PrefetchScalarGridSpec(
            num_scalar_prefetch=0,
            grid=(B // tb, T // tt, Vp // tn),
            in_specs=[pl.BlockSpec((tt, tb, H), lambda bi, ti, vi: (ti, bi, 0)),
                      pl.BlockSpec((H, tn), lambda bi, ti, vi: (0, vi)),
                      pl.BlockSpec((1, tn), lambda bi, ti, vi: (0, vi))],
            out_specs=pl.BlockSpec((tb, tt, tn), lambda bi, ti, vi: (bi, ti, vi))),
        compiler_params=pltpu.CompilerParams(
            dimension_semantics=("parallel", "parallel", "parallel"),
            vmem_limit_bytes=_vmem_limit()),
    )(y, w, b)
    if Vp != V:
        out = out[:, :, :V]
    return out


# ----------------------------------------------------------------------------
# GRU recurrence kernels.
#   gi      (TC, TB, 3H) bf16  precomputed x @ W_ih + b_ih for a chunk of timesteps
#   gstatic (TB, 3H) f32       static gate term (decoder: ctx @ W_ih_ctx), 0 for enc
#   w_hh    (H, 3H) bf16       recurrent weight (only matmul left inside the loop)
#   b_hh    (1, 3H) f32
#   h0      (TB, H) f32        initial hidden state for this batch block
#   Outputs: [y (TC, TB, H) bf16,] hN (TB, H) f32.  Scratch: h_sc (TB, H) f32.
# Grid = (B // TB [parallel], T // TC [arbitrary: carried recurrence]).
# ----------------------------------------------------------------------------
def _gru_chunk(gi_ref, gstat_ref, whh_ref, bhh_ref, h0_ref, h_sc, y_ref):
    @pl.when(pl.program_id(1) == 0)            # first time-chunk of this batch block
    def _():
        h_sc[...] = h0_ref[...].astype(jnp.float32)

    TB, H = h_sc.shape
    TC = gi_ref.shape[0]
    H2 = 2 * H

    # Chunk-constant values hoisted out of the serial loop.
    whh = whh_ref[...]                                   # bf16 MXU operand (resident)
    bhh = bhh_ref[...].astype(jnp.float32)               # (1, 3H)
    gstat = gstat_ref[...].astype(jnp.float32)           # (TB, 3H)
    # Fold the r/z thirds of b_hh into the static term (the n third is multiplied by
    # r before tanh, so it stays inside the loop).
    gstat_rz = gstat[:, :H2] + bhh[:, :H2]               # (TB, 2H)
    gstat_n = gstat[:, H2:]                              # (TB, H)
    bhh_n = bhh[:, H2:]                                  # (1, H)

    def step(t, h):
        gi = gi_ref[t].astype(jnp.float32)               # (TB, 3H), bf16 -> f32
        gh = jnp.dot(h.astype(whh.dtype), whh,
                     preferred_element_type=jnp.float32)  # (TB, 3H)
        # PyTorch nn.GRU gate order (r, z, n); r and z share one sigmoid over 2H lanes.
        rz = jax.nn.sigmoid(gi[:, :H2] + gstat_rz + gh[:, :H2])
        r, z = rz[:, :H], rz[:, H:]
        n = jnp.tanh(gi[:, H2:] + gstat_n + r * (gh[:, H2:] + bhh_n))
        h_new = (1.0 - z) * n + z * h
        if y_ref is not None:
            y_ref[t] = h_new.astype(y_ref.dtype)
        return h_new

    # Partial unroll so the scheduler can overlap step t's VPU/EUP gate math with
    # step t+1's gi load/cast and MXU pushes.
    h_fin = lax.fori_loop(0, TC, step, h_sc[...], unroll=min(TC, 8))
    h_sc[...] = h_fin
    return h_fin


def gru_kernel_seq(gi_ref, gstat_ref, whh_ref, bhh_ref, h0_ref,
                   y_ref, hN_ref, h_sc):
    h_fin = _gru_chunk(gi_ref, gstat_ref, whh_ref, bhh_ref, h0_ref, h_sc, y_ref)

    @pl.when(pl.program_id(1) == pl.num_programs(1) - 1)   # store hN once per batch blk
    def _():
        hN_ref[...] = h_fin.astype(hN_ref.dtype)


def gru_kernel_last(gi_ref, gstat_ref, whh_ref, bhh_ref, h0_ref,
                    hN_ref, h_sc):
    h_fin = _gru_chunk(gi_ref, gstat_ref, whh_ref, bhh_ref, h0_ref, h_sc, None)

    @pl.when(pl.program_id(1) == pl.num_programs(1) - 1)
    def _():
        hN_ref[...] = h_fin.astype(hN_ref.dtype)


def gru_forward(gi, gstatic, w_hh, b_hh, h0, *, emit_y=True):
    """gi: (T, B, 3H) bf16; gstatic: (B, 3H) f32; w_hh: (H, 3H) bf16; b_hh: (1, 3H) f32;
    h0: (B, H) f32.  Returns (y (T,B,H) bf16, hN (B,H) f32) if emit_y else hN only."""
    T, B, G = gi.shape
    H = h0.shape[-1]
    vmem_cap, n_tc = _chip()

    # Batch split only on multi-TC chips (v7x): on 1-TC chips (v5e/v6e) it just halves
    # MXU row occupancy and doubles the number of recurrent chunk iterations.
    TB = B
    if n_tc >= 2 and B >= 16 and (B // 2) % 8 == 0:
        TB = B // 2

    # Budget-driven time-chunk: double-buffered gi (+ y) tiles must fit next to the
    # resident weights/scratch with headroom for Mosaic internals.
    gi_isz = jnp.dtype(gi.dtype).itemsize
    resident = (H * G * jnp.dtype(w_hh.dtype).itemsize + G * 4
                + TB * G * 4 + 3 * TB * H * 4)
    budget = int(vmem_cap * 0.5) - resident

    def _chunk_bytes(tc):
        buf = tc * TB * G * gi_isz
        if emit_y:
            buf += tc * TB * H * 2
        return 2 * buf

    TC = 1
    for c in (256, 128, 64, 32, 16, 8, 4, 2, 1):
        if T % c == 0 and _chunk_bytes(c) <= budget:
            TC = c
            break

    def const_spec(shape, index_map):
        # Chunk-invariant operands: double-buffering them only wastes VMEM.
        if _SINGLE_BUFFER:
            return pl.BlockSpec(shape, index_map, pipeline_mode=pl.Buffered(1))
        return pl.BlockSpec(shape, index_map)

    in_specs = [
        pl.BlockSpec((TC, TB, G), lambda b, t: (t, b, 0)),   # gi streams per chunk
        const_spec((TB, G), lambda b, t: (b, 0)),            # gstatic
        const_spec((H, G), lambda b, t: (0, 0)),             # w_hh (resident)
        const_spec((1, G), lambda b, t: (0, 0)),             # b_hh
        const_spec((TB, H), lambda b, t: (b, 0)),            # h0
    ]
    grid = (B // TB, T // TC)
    cparams = pltpu.CompilerParams(
        dimension_semantics=("parallel", "arbitrary"),
        vmem_limit_bytes=_vmem_limit())

    if emit_y:
        y, hN = pl.pallas_call(
            gru_kernel_seq,
            out_shape=(jax.ShapeDtypeStruct((T, B, H), jnp.bfloat16),
                       jax.ShapeDtypeStruct((B, H), jnp.float32)),
            grid_spec=pltpu.PrefetchScalarGridSpec(
                num_scalar_prefetch=0, grid=grid, in_specs=in_specs,
                out_specs=(pl.BlockSpec((TC, TB, H), lambda b, t: (t, b, 0)),
                           pl.BlockSpec((TB, H), lambda b, t: (b, 0))),
                scratch_shapes=[pltpu.VMEM((TB, H), jnp.float32)]),
            compiler_params=cparams,
        )(gi, gstatic, w_hh, b_hh, h0)
        return y, hN

    hN = pl.pallas_call(
        gru_kernel_last,
        out_shape=jax.ShapeDtypeStruct((B, H), jnp.float32),
        grid_spec=pltpu.PrefetchScalarGridSpec(
            num_scalar_prefetch=0, grid=grid, in_specs=in_specs,
            out_specs=pl.BlockSpec((TB, H), lambda b, t: (b, 0)),
            scratch_shapes=[pltpu.VMEM((TB, H), jnp.float32)]),
        compiler_params=cparams,
    )(gi, gstatic, w_hh, b_hh, h0)
    return hN


# ----------------------------------------------------------------------------
# Parameters (deterministic, synthetic). Matmul weights bf16; biases f32.
# Decoder input weight is stored pre-split into the X part and the context part
# (concat([X, ctx]) @ W_ih  ==  X @ W_ih_x + ctx @ W_ih_c).
# ----------------------------------------------------------------------------
def init_params(key, vocab_src, vocab_tgt, embed, hidden):
    ks = jax.random.split(key, 8)
    s = 0.1

    def w(k, shape):
        return (s * jax.random.normal(k, shape, jnp.float32)).astype(jnp.bfloat16)

    p = {}
    p["enc_emb"] = w(ks[0], (vocab_src, embed))
    p["enc_w_ih"] = w(ks[1], (embed, 3 * hidden))
    p["enc_w_hh"] = w(ks[2], (hidden, 3 * hidden))
    p["enc_b_ih"] = jnp.zeros((1, 3 * hidden), jnp.float32)
    p["enc_b_hh"] = jnp.zeros((1, 3 * hidden), jnp.float32)
    p["dec_emb"] = w(ks[3], (vocab_tgt, embed))
    p["dec_w_ih_x"] = w(ks[4], (embed, 3 * hidden))
    p["dec_w_ih_c"] = w(ks[7], (hidden, 3 * hidden))
    p["dec_w_hh"] = w(ks[5], (hidden, 3 * hidden))
    p["dec_b_ih"] = jnp.zeros((1, 3 * hidden), jnp.float32)
    p["dec_b_hh"] = jnp.zeros((1, 3 * hidden), jnp.float32)
    p["dense_w"] = w(ks[6], (hidden, vocab_tgt))
    p["dense_b"] = jnp.zeros((1, vocab_tgt), jnp.float32)
    return p


# ----------------------------------------------------------------------------
# Encoder / Decoder / EncoderDecoder forward (mirrors the PyTorch base class:
#   enc_outputs = encoder(enc_X); dec_state = decoder.init_state(enc_outputs);
#   return decoder(dec_X, dec_state))
# ----------------------------------------------------------------------------
def encoder_fwd(params, enc_X):
    B, T = enc_X.shape
    E = params["enc_emb"].shape[1]
    H = params["enc_w_hh"].shape[0]
    # TODO(synk): embedding-table gather stays an XLA gather (a Pallas DMA-gather
    # kernel is possible but not warranted at these sizes).
    X = params["enc_emb"][enc_X.T].reshape(T * B, E)     # gather directly in seq-major
    # Hoisted input projection for ALL timesteps: one big MXU matmul; gi kept in bf16.
    gi = matmul_bias(X, params["enc_w_ih"], params["enc_b_ih"],
                     out_dtype=jnp.bfloat16).reshape(T, B, 3 * H)
    gstatic = jnp.zeros((B, 3 * H), jnp.float32)         # encoder has no static term
    h0 = jnp.zeros((B, H), jnp.float32)
    # The encoder's full hidden sequence is never consumed (only hN feeds the decoder),
    # so it is not materialized at all.
    hN = gru_forward(gi, gstatic, params["enc_w_hh"], params["enc_b_hh"], h0,
                     emit_y=False)
    return None, hN[None]                                # (enc y skipped, state (1,B,H))


def decoder_init_state(enc_outputs):
    return enc_outputs[1]                                # (1, B, H)


def decoder_fwd(params, dec_X, state):
    B, T = dec_X.shape
    E = params["dec_emb"].shape[1]
    H = state.shape[-1]
    ctx = state[-1]                                      # (B, H) f32

    X = params["dec_emb"][dec_X.T].reshape(T * B, E)     # seq-major gather, no transpose
    gi = matmul_bias(X, params["dec_w_ih_x"], params["dec_b_ih"],
                     out_dtype=jnp.bfloat16).reshape(T, B, 3 * H)
    # Context part of the concat is constant over T: project ONCE to (B, 3H) and let
    # the GRU kernel add it per step (tiny one-off XLA matmul).
    gstatic = jnp.dot(ctx.astype(params["dec_w_ih_c"].dtype), params["dec_w_ih_c"],
                      preferred_element_type=jnp.float32)

    y, hN = gru_forward(gi, gstatic, params["dec_w_hh"], params["dec_b_hh"], ctx,
                        emit_y=True)

    # Dense head: permute fused into the kernel's BlockSpecs; logits come out (B, T, V).
    # (Switch out_dtype to bf16 if the downstream loss upcasts anyway.)
    logits = dense_head(y, params["dense_w"], params["dense_b"],
                        out_dtype=jnp.float32)
    return logits, hN[None]


def encoder_decoder_forward(params, enc_X, dec_X):
    enc_outputs = encoder_fwd(params, enc_X)
    dec_state = decoder_init_state(enc_outputs)
    return decoder_fwd(params, dec_X, dec_state)


if __name__ == "__main__":
    B, T = 2, 8
    VOCAB_SRC, VOCAB_TGT = 16, 16
    EMBED, HIDDEN = 8, 16

    key = jax.random.PRNGKey(0)
    kp, ke, kd = jax.random.split(key, 3)
    params = init_params(kp, VOCAB_SRC, VOCAB_TGT, EMBED, HIDDEN)

    enc_X = jax.random.randint(ke, (B, T), 0, VOCAB_SRC, dtype=jnp.int32)
    dec_X = jax.random.randint(kd, (B, T), 0, VOCAB_TGT, dtype=jnp.int32)

    logits, dec_state = jax.jit(encoder_decoder_forward)(params, enc_X, dec_X)
    jax.block_until_ready((logits, dec_state))

    assert logits.shape == (B, T, VOCAB_TGT)
    assert dec_state.shape == (1, B, HIDDEN)
    assert bool(jnp.isfinite(logits).all())
    print("KERNEL_OK")
</pallas_src>

<mosaic_0001>
module attributes {stable_mosaic.version = 11 : i64} {
  func.func @_copy(%arg0: i32, %arg1: memref<8x128xf32, #tpu.memory_space<vmem>>, %arg2: memref<8x128xf32, #tpu.memory_space<vmem>>) attributes {dimension_semantics = [#tpu.dimension_semantics<arbitrary>], iteration_bounds = array<i64: 2>, scalar_prefetch = 0 : i64, scratch_operands = 0 : i64, tpu.core_type = #tpu.core_type<tc>, window_params = [{pipeline_mode = #tpu.pipeline_mode<synchronous>, transform_indices = @transform_0, window_bounds = array<i64: 8, 128>}, {pipeline_mode = #tpu.pipeline_mode<synchronous>, transform_indices = @transform_1, window_bounds = array<i64: 8, 128>}]} {
    %c0 = arith.constant 0 : index
    %c0_0 = arith.constant 0 : index
    %0 = vector.load %arg1[%c0, %c0_0] : memref<8x128xf32, #tpu.memory_space<vmem>>, vector<8x128xf32>
    %c0_1 = arith.constant 0 : index
    %c0_2 = arith.constant 0 : index
    %1 = vector.load %arg2[%c0_1, %c0_2] : memref<8x128xf32, #tpu.memory_space<vmem>>, vector<8x128xf32>
    tpu.vector_store %arg2[%c0_1, %c0_2], %0 {strides = array<i32>} : memref<8x128xf32, #tpu.memory_space<vmem>>, vector<8x128xf32>,
    return
  }
  func.func @transform_0(%arg0: i32) -> (i32, i32) {
    %c0_i32 = arith.constant 0 : i32
    %c0_i32_0 = arith.constant 0 : i32
    %c0_i32_1 = arith.constant 0 : i32
    return %c0_i32, %c0_i32_0 : i32, i32
  }
  func.func @transform_1(%arg0: i32) -> (i32, i32) {
    %c0_i32 = arith.constant 0 : i32
    %c0_i32_0 = arith.constant 0 : i32
    %c0_i32_1 = arith.constant 0 : i32
    return %c0_i32, %c0_i32_0 : i32, i32
  }
}

module attributes {stable_mosaic.version = 11 : i64} {
  func.func @matmul_bias_kernel(%arg0: i32, %arg1: i32, %arg2: memref<16x8xbf16, #tpu.memory_space<vmem>>, %arg3: memref<8x48xbf16, #tpu.memory_space<vmem>>, %arg4: memref<1x48xf32, #tpu.memory_space<vmem>>, %arg5: memref<16x48xbf16, #tpu.memory_space<vmem>>) attributes {dimension_semantics = [#tpu.dimension_semantics<parallel>, #tpu.dimension_semantics<parallel>], iteration_bounds = array<i64: 1, 1>, scalar_prefetch = 0 : i64, scratch_operands = 0 : i64, tpu.core_type = #tpu.core_type<tc>, window_params = [{transform_indices = @transform_0, window_bounds = array<i64: 16, 8>}, {transform_indices = @transform_1, window_bounds = array<i64: 8, 48>}, {transform_indices = @transform_2, window_bounds = array<i64: 1, 48>}, {transform_indices = @transform_3, window_bounds = array<i64: 16, 48>}]} {
    %c0 = arith.constant 0 : index
    %c0_0 = arith.constant 0 : index
    %0 = vector.load %arg2[%c0, %c0_0] : memref<16x8xbf16, #tpu.memory_space<vmem>>, vector<16x8xbf16>
    %c0_1 = arith.constant 0 : index
    %c0_2 = arith.constant 0 : index
    %1 = vector.load %arg3[%c0_1, %c0_2] : memref<8x48xbf16, #tpu.memory_space<vmem>>, vector<8x48xbf16>
    %cst = arith.constant dense<0.000000e+00> : vector<16x48xf32>
    %2 = tpu.matmul %0, %1, %cst {dimension_numbers = #tpu.dot_dimension_numbers<[1], [0], [0], [1], [0, 0, 1, 1], [], []>} : vector<16x8xbf16>, vector<8x48xbf16>, vector<16x48xf32> -> vector<16x48xf32>
    %c0_3 = arith.constant 0 : index
    %c0_4 = arith.constant 0 : index
    %3 = vector.load %arg4[%c0_3, %c0_4] : memref<1x48xf32, #tpu.memory_space<vmem>>, vector<1x48xf32>
    %4 = vector.broadcast %3 : vector<1x48xf32> to vector<16x48xf32>
    %5 = arith.addf %2, %4 : vector<16x48xf32>
    %6 = arith.truncf %5 : vector<16x48xf32> to vector<16x48xbf16>
    %c0_5 = arith.constant 0 : index
    %c0_6 = arith.constant 0 : index
    %7 = vector.load %arg5[%c0_5, %c0_6] : memref<16x48xbf16, #tpu.memory_space<vmem>>, vector<16x48xbf16>
    tpu.vector_store %arg5[%c0_5, %c0_6], %6 {strides = array<i32>} : memref<16x48xbf16, #tpu.memory_space<vmem>>, vector<16x48xbf16>,
    return
  }
  func.func @transform_0(%arg0: i32, %arg1: i32) -> (i32, i32) {
    %c0_i32 = arith.constant 0 : i32
    %c0_i32_0 = arith.constant 0 : i32
    return %arg0, %c0_i32 : i32, i32
  }
  func.func @transform_1(%arg0: i32, %arg1: i32) -> (i32, i32) {
    %c0_i32 = arith.constant 0 : i32
    %c0_i32_0 = arith.constant 0 : i32
    return %c0_i32, %arg1 : i32, i32
  }
  func.func @transform_2(%arg0: i32, %arg1: i32) -> (i32, i32) {
    %c0_i32 = arith.constant 0 : i32
    %c0_i32_0 = arith.constant 0 : i32
    return %c0_i32, %arg1 : i32, i32
  }
  func.func @transform_3(%arg0: i32, %arg1: i32) -> (i32, i32) {
    %c0_i32 = arith.constant 0 : i32
    return %arg0, %arg1 : i32, i32
  }
}

module attributes {stable_mosaic.version = 11 : i64} {
  func.func @gru_kernel_last(%arg0: i32, %arg1: i32, %arg2: memref<8x2x48xbf16, #tpu.memory_space<vmem>>, %arg3: memref<2x48xf32, #tpu.memory_space<vmem>>, %arg4: memref<16x48xbf16, #tpu.memory_space<vmem>>, %arg5: memref<1x48xf32, #tpu.memory_space<vmem>>, %arg6: memref<2x16xf32, #tpu.memory_space<vmem>>, %arg7: memref<2x16xf32, #tpu.memory_space<vmem>>, %arg8: memref<2x16xf32, #tpu.memory_space<vmem>>) attributes {dimension_semantics = [#tpu.dimension_semantics<parallel>, #tpu.dimension_semantics<arbitrary>], iteration_bounds = array<i64: 1, 1>, scalar_prefetch = 0 : i64, scratch_operands = 1 : i64, tpu.core_type = #tpu.core_type<tc>, window_params = [{transform_indices = @transform_0, window_bounds = array<i64: 8, 2, 48>}, {transform_indices = @transform_1, window_bounds = array<i64: 2, 48>}, {pipeline_mode = #tpu.pipeline_mode<synchronous>, transform_indices = @transform_2, window_bounds = array<i64: 16, 48>}, {pipeline_mode = #tpu.pipeline_mode<synchronous>, transform_indices = @transform_3, window_bounds = array<i64: 1, 48>}, {transform_indices = @transform_4, window_bounds = array<i64: 2, 16>}, {transform_indices = @transform_5, window_bounds = array<i64: 2, 16>}]} {
    %c0_i32 = arith.constant 0 : i32
    %0 = arith.cmpi eq, %arg1, %c0_i32 : i32
    %1 = arith.extui %0 : i1 to i32
    %c0_i32_0 = arith.constant 0 : i32
    %2 = arith.cmpi ne, %1, %c0_i32_0 : i32
    scf.if %2 {
      %c0_52 = arith.constant 0 : index
      %c0_53 = arith.constant 0 : index
      %257 = vector.load %arg6[%c0_52, %c0_53] : memref<2x16xf32, #tpu.memory_space<vmem>>, vector<2x16xf32>
      %c0_54 = arith.constant 0 : index
      %c0_55 = arith.constant 0 : index
      %258 = vector.load %arg8[%c0_54, %c0_55] : memref<2x16xf32, #tpu.memory_space<vmem>>, vector<2x16xf32>
      tpu.vector_store %arg8[%c0_54, %c0_55], %257 {strides = array<i32>} : memref<2x16xf32, #tpu.memory_space<vmem>>, vector<2x16xf32>,
    } else {
    }
    %c0 = arith.constant 0 : index
    %c0_1 = arith.constant 0 : index
    %3 = vector.load %arg4[%c0, %c0_1] : memref<16x48xbf16, #tpu.memory_space<vmem>>, vector<16x48xbf16>
    %c0_2 = arith.constant 0 : index
    %c0_3 = arith.constant 0 : index
    %4 = vector.load %arg5[%c0_2, %c0_3] : memref<1x48xf32, #tpu.memory_space<vmem>>, vector<1x48xf32>
    %c0_4 = arith.constant 0 : index
    %c0_5 = arith.constant 0 : index
    %5 = vector.load %arg3[%c0_4, %c0_5] : memref<2x48xf32, #tpu.memory_space<vmem>>, vector<2x48xf32>
    %6 = vector.extract_strided_slice %5 {offsets = [0, 0], sizes = [2, 32], strides = [1, 1]} : vector<2x48xf32> to vector<2x32xf32>
    %7 = vector.extract_strided_slice %4 {offsets = [0, 0], sizes = [1, 32], strides = [1, 1]} : vector<1x48xf32> to vector<1x32xf32>
    %8 = vector.broadcast %7 : vector<1x32xf32> to vector<2x32xf32>
    %9 = arith.addf %6, %8 : vector<2x32xf32>
    %10 = vector.extract_strided_slice %5 {offsets = [0, 32], sizes = [2, 16], strides = [1, 1]} : vector<2x48xf32> to vector<2x16xf32>
    %11 = vector.extract_strided_slice %4 {offsets = [0, 32], sizes = [1, 16], strides = [1, 1]} : vector<1x48xf32> to vector<1x16xf32>
    %c0_6 = arith.constant 0 : index
    %c0_7 = arith.constant 0 : index
    %12 = vector.load %arg8[%c0_6, %c0_7] : memref<2x16xf32, #tpu.memory_space<vmem>>, vector<2x16xf32>
    %c0_i32_8 = arith.constant 0 : i32
    %13 = arith.index_cast %c0_i32_8 : i32 to index
    %c0_9 = arith.constant 0 : index
    %c0_10 = arith.constant 0 : index
    %14 = vector.load %arg2[%13, %c0_9, %c0_10] : memref<8x2x48xbf16, #tpu.memory_space<vmem>>, vector<1x2x48xbf16>
    %15 = vector.shape_cast %14 : vector<1x2x48xbf16> to vector<2x48xbf16>
    %16 = arith.extf %15 : vector<2x48xbf16> to vector<2x48xf32>
    %17 = arith.truncf %12 : vector<2x16xf32> to vector<2x16xbf16>
    %cst = arith.constant dense<0.000000e+00> : vector<2x48xf32>
    %18 = tpu.matmul %17, %3, %cst {dimension_numbers = #tpu.dot_dimension_numbers<[1], [0], [0], [1], [0, 0, 1, 1], [], []>} : vector<2x16xbf16>, vector<16x48xbf16>, vector<2x48xf32> -> vector<2x48xf32>
    %19 = vector.extract_strided_slice %16 {offsets = [0, 0], sizes = [2, 32], strides = [1, 1]} : vector<2x48xf32> to vector<2x32xf32>
    %20 = arith.addf %19, %9 : vector<2x32xf32>
    %21 = vector.extract_strided_slice %18 {offsets = [0, 0], sizes = [2, 32], strides = [1, 1]} : vector<2x48xf32> to vector<2x32xf32>
    %22 = arith.addf %20, %21 : vector<2x32xf32>
    %23 = arith.negf %22 : vector<2x32xf32>
    %24 = math.exp %23 : vector<2x32xf32>
    %cst_11 = arith.constant 1.000000e+00 : f32
    %25 = vector.broadcast %cst_11 : f32 to vector<2x32xf32>
    %26 = arith.addf %25, %24 : vector<2x32xf32>
    %27 = arith.divf %25, %26 : vector<2x32xf32>
    %28 = vector.extract_strided_slice %27 {offsets = [0, 0], sizes = [2, 16], strides = [1, 1]} : vector<2x32xf32> to vector<2x16xf32>
    %29 = vector.extract_strided_slice %27 {offsets = [0, 16], sizes = [2, 16], strides = [1, 1]} : vector<2x32xf32> to vector<2x16xf32>
    %30 = vector.extract_strided_slice %16 {offsets = [0, 32], sizes = [2, 16], strides = [1, 1]} : vector<2x48xf32> to vector<2x16xf32>
    %31 = arith.addf %30, %10 : vector<2x16xf32>
    %32 = vector.extract_strided_slice %18 {offsets = [0, 32], sizes = [2, 16], strides = [1, 1]} : vector<2x48xf32> to vector<2x16xf32>
    %33 = vector.broadcast %11 : vector<1x16xf32> to vector<2x16xf32>
    %34 = arith.addf %32, %33 : vector<2x16xf32>
    %35 = arith.mulf %28, %34 : vector<2x16xf32>
    %36 = arith.addf %31, %35 : vector<2x16xf32>
    %37 = math.tanh %36 : vector<2x16xf32>
    %cst_12 = arith.constant 1.000000e+00 : f32
    %38 = vector.broadcast %cst_12 : f32 to vector<2x16xf32>
    %39 = arith.subf %38, %29 : vector<2x16xf32>
    %40 = arith.mulf %39, %37 : vector<2x16xf32>
    %41 = arith.mulf %29, %12 : vector<2x16xf32>
    %42 = arith.addf %40, %41 : vector<2x16xf32>
    %c1_i32 = arith.constant 1 : i32
    %43 = arith.index_cast %c1_i32 : i32 to index
    %c0_13 = arith.constant 0 : index
    %c0_14 = arith.constant 0 : index
    %44 = vector.load %arg2[%43, %c0_13, %c0_14] : memref<8x2x48xbf16, #tpu.memory_space<vmem>>, vector<1x2x48xbf16>
    %45 = vector.shape_cast %44 : vector<1x2x48xbf16> to vector<2x48xbf16>
    %46 = arith.extf %45 : vector<2x48xbf16> to vector<2x48xf32>
    %47 = arith.truncf %42 : vector<2x16xf32> to vector<2x16xbf16>
    %cst_15 = arith.constant dense<0.000000e+00> : vector<2x48xf32>
    %48 = tpu.matmul %47, %3, %cst_15 {dimension_numbers = #tpu.dot_dimension_numbers<[1], [0], [0], [1], [0, 0, 1, 1], [], []>} : vector<2x16xbf16>, vector<16x48xbf16>, vector<2x48xf32> -> vector<2x48xf32>
    %49 = vector.extract_strided_slice %46 {offsets = [0, 0], sizes = [2, 32], strides = [1, 1]} : vector<2x48xf32> to vector<2x32xf32>
    %50 = arith.addf %49, %9 : vector<2x32xf32>
    %51 = vector.extract_strided_slice %48 {offsets = [0, 0], sizes = [2, 32], strides = [1, 1]} : vector<2x48xf32> to vector<2x32xf32>
    %52 = arith.addf %50, %51 : vector<2x32xf32>
    %53 = arith.negf %52 : vector<2x32xf32>
    %54 = math.exp %53 : vector<2x32xf32>
    %cst_16 = arith.constant 1.000000e+00 : f32
    %55 = vector.broadcast %cst_16 : f32 to vector<2x32xf32>
    %56 = arith.addf %55, %54 : vector<2x32xf32>
    %57 = arith.divf %55, %56 : vector<2x32xf32>
    %58 = vector.extract_strided_slice %57 {offsets = [0, 0], sizes = [2, 16], strides = [1, 1]} : vector<2x32xf32> to vector<2x16xf32>
    %59 = vector.extract_strided_slice %57 {offsets = [0, 16], sizes = [2, 16], strides = [1, 1]} : vector<2x32xf32> to vector<2x16xf32>
    %60 = vector.extract_strided_slice %46 {offsets = [0, 32], sizes = [2, 16], strides = [1, 1]} : vector<2x48xf32> to vector<2x16xf32>
    %61 = arith.addf %60, %10 : vector<2x16xf32>
    %62 = vector.extract_strided_slice %48 {offsets = [0, 32], sizes = [2, 16], strides = [1, 1]} : vector<2x48xf32> to vector<2x16xf32>
    %63 = vector.broadcast %11 : vector<1x16xf32> to vector<2x16xf32>
    %64 = arith.addf %62, %63 : vector<2x16xf32>
    %65 = arith.mulf %58, %64 : vector<2x16xf32>
    %66 = arith.addf %61, %65 : vector<2x16xf32>
    %67 = math.tanh %66 : vector<2x16xf32>
    %cst_17 = arith.constant 1.000000e+00 : f32
    %68 = vector.broadcast %cst_17 : f32 to vector<2x16xf32>
    %69 = arith.subf %68, %59 : vector<2x16xf32>
    %70 = arith.mulf %69, %67 : vector<2x16xf32>
    %71 = arith.mulf %59, %42 : vector<2x16xf32>
    %72 = arith.addf %70, %71 : vector<2x16xf32>
    %c2_i32 = arith.constant 2 : i32
    %73 = arith.index_cast %c2_i32 : i32 to index
    %c0_18 = arith.constant 0 : index
    %c0_19 = arith.constant 0 : index
    %74 = vector.load %arg2[%73, %c0_18, %c0_19] : memref<8x2x48xbf16, #tpu.memory_space<vmem>>, vector<1x2x48xbf16>
    %75 = vector.shape_cast %74 : vector<1x2x48xbf16> to vector<2x48xbf16>
    %76 = arith.extf %75 : vector<2x48xbf16> to vector<2x48xf32>
    %77 = arith.truncf %72 : vector<2x16xf32> to vector<2x16xbf16>
    %cst_20 = arith.constant dense<0.000000e+00> : vector<2x48xf32>
    %78 = tpu.matmul %77, %3, %cst_20 {dimension_numbers = #tpu.dot_dimension_numbers<[1], [0], [0], [1], [0, 0, 1, 1], [], []>} : vector<2x16xbf16>, vector<16x48xbf16>, vector<2x48xf32> -> vector<2x48xf32>
    %79 = vector.extract_strided_slice %76 {offsets = [0, 0], sizes = [2, 32], strides = [1, 1]} : vector<2x48xf32> to vector<2x32xf32>
    %80 = arith.addf %79, %9 : vector<2x32xf32>
    %81 = vector.extract_strided_slice %78 {offsets = [0, 0], sizes = [2, 32], strides = [1, 1]} : vector<2x48xf32> to vector<2x32xf32>
    %82 = arith.addf %80, %81 : vector<2x32xf32>
    %83 = arith.negf %82 : vector<2x32xf32>
    %84 = math.exp %83 : vector<2x32xf32>
    %cst_21 = arith.constant 1.000000e+00 : f32
    %85 = vector.broadcast %cst_21 : f32 to vector<2x32xf32>
    %86 = arith.addf %85, %84 : vector<2x32xf32>
    %87 = arith.divf %85, %86 : vector<2x32xf32>
    %88 = vector.extract_strided_slice %87 {offsets = [0, 0], sizes = [2, 16], strides = [1, 1]} : vector<2x32xf32> to vector<2x16xf32>
    %89 = vector.extract_strided_slice %87 {offsets = [0, 16], sizes = [2, 16], strides = [1, 1]} : vector<2x32xf32> to vector<2x16xf32>
    %90 = vector.extract_strided_slice %76 {offsets = [0, 32], sizes = [2, 16], strides = [1, 1]} : vector<2x48xf32> to vector<2x16xf32>
    %91 = arith.addf %90, %10 : vector<2x16xf32>
    %92 = vector.extract_strided_slice %78 {offsets = [0, 32], sizes = [2, 16], strides = [1, 1]} : vector<2x48xf32> to vector<2x16xf32>
    %93 = vector.broadcast %11 : vector<1x16xf32> to vector<2x16xf32>
    %94 = arith.addf %92, %93 : vector<2x16xf32>
    %95 = arith.mulf %88, %94 : vector<2x16xf32>
    %96 = arith.addf %91, %95 : vector<2x16xf32>
    %97 = math.tanh %96 : vector<2x16xf32>
    %cst_22 = arith.constant 1.000000e+00 : f32
    %98 = vector.broadcast %cst_22 : f32 to vector<2x16xf32>
    %99 = arith.subf %98, %89 : vector<2x16xf32>
    %100 = arith.mulf %99, %97 : vector<2x16xf32>
    %101 = arith.mulf %89, %72 : vector<2x16xf32>
    %102 = arith.addf %100, %101 : vector<2x16xf32>
    %c3_i32 = arith.constant 3 : i32
    %103 = arith.index_cast %c3_i32 : i32 to index
    %c0_23 = arith.constant 0 : index
    %c0_24 = arith.constant 0 : index
    %104 = vector.load %arg2[%103, %c0_23, %c0_24] : memref<8x2x48xbf16, #tpu.memory_space<vmem>>, vector<1x2x48xbf16>
    %105 = vector.shape_cast %104 : vector<1x2x48xbf16> to vector<2x48xbf16>
    %106 = arith.extf %105 : vector<2x48xbf16> to vector<2x48xf32>
    %107 = arith.truncf %102 : vector<2x16xf32> to vector<2x16xbf16>
    %cst_25 = arith.constant dense<0.000000e+00> : vector<2x48xf32>
    %108 = tpu.matmul %107, %3, %cst_25 {dimension_numbers = #tpu.dot_dimension_numbers<[1], [0], [0], [1], [0, 0, 1, 1], [], []>} : vector<2x16xbf16>, vector<16x48xbf16>, vector<2x48xf32> -> vector<2x48xf32>
    %109 = vector.extract_strided_slice %106 {offsets = [0, 0], sizes = [2, 32], strides = [1, 1]} : vector<2x48xf32> to vector<2x32xf32>
    %110 = arith.addf %109, %9 : vector<2x32xf32>
    %111 = vector.extract_strided_slice %108 {offsets = [0, 0], sizes = [2, 32], strides = [1, 1]} : vector<2x48xf32> to vector<2x32xf32>
    %112 = arith.addf %110, %111 : vector<2x32xf32>
    %113 = arith.negf %112 : vector<2x32xf32>
    %114 = math.exp %113 : vector<2x32xf32>
    %cst_26 = arith.constant 1.000000e+00 : f32
    %115 = vector.broadcast %cst_26 : f32 to vector<2x32xf32>
    %116 = arith.addf %115, %114 : vector<2x32xf32>
    %117 = arith.divf %115, %116 : vector<2x32xf32>
    %118 = vector.extract_strided_slice %117 {offsets = [0, 0], sizes = [2, 16], strides = [1, 1]} : vector<2x32xf32> to vector<2x16xf32>
    %119 = vector.extract_strided_slice %117 {offsets = [0, 16], sizes = [2, 16], strides = [1, 1]} : vector<2x32xf32> to vector<2x16xf32>
    %120 = vector.extract_strided_slice %106 {offsets = [0, 32], sizes = [2, 16], strides = [1, 1]} : vector<2x48xf32> to vector<2x16xf32>
    %121 = arith.addf %120, %10 : vector<2x16xf32>
    %122 = vector.extract_strided_slice %108 {offsets = [0, 32], sizes = [2, 16], strides = [1, 1]} : vector<2x48xf32> to vector<2x16xf32>
    %123 = vector.broadcast %11 : vector<1x16xf32> to vector<2x16xf32>
    %124 = arith.addf %122, %123 : vector<2x16xf32>
    %125 = arith.mulf %118, %124 : vector<2x16xf32>
    %126 = arith.addf %121, %125 : vector<2x16xf32>
    %127 = math.tanh %126 : vector<2x16xf32>
    %cst_27 = arith.constant 1.000000e+00 : f32
    %128 = vector.broadcast %cst_27 : f32 to vector<2x16xf32>
    %129 = arith.subf %128, %119 : vector<2x16xf32>
    %130 = arith.mulf %129, %127 : vector<2x16xf32>
    %131 = arith.mulf %119, %102 : vector<2x16xf32>
    %132 = arith.addf %130, %131 : vector<2x16xf32>
    %c4_i32 = arith.constant 4 : i32
    %133 = arith.index_cast %c4_i32 : i32 to index
    %c0_28 = arith.constant 0 : index
    %c0_29 = arith.constant 0 : index
    %134 = vector.load %arg2[%133, %c0_28, %c0_29] : memref<8x2x48xbf16, #tpu.memory_space<vmem>>, vector<1x2x48xbf16>
    %135 = vector.shape_cast %134 : vector<1x2x48xbf16> to vector<2x48xbf16>
    %136 = arith.extf %135 : vector<2x48xbf16> to vector<2x48xf32>
    %137 = arith.truncf %132 : vector<2x16xf32> to vector<2x16xbf16>
    %cst_30 = arith.constant dense<0.000000e+00> : vector<2x48xf32>
    %138 = tpu.matmul %137, %3, %cst_30 {dimension_numbers = #tpu.dot_dimension_numbers<[1], [0], [0], [1], [0, 0, 1, 1], [], []>} : vector<2x16xbf16>, vector<16x48xbf16>, vector<2x48xf32> -> vector<2x48xf32>
    %139 = vector.extract_strided_slice %136 {offsets = [0, 0], sizes = [2, 32], strides = [1, 1]} : vector<2x48xf32> to vector<2x32xf32>
    %140 = arith.addf %139, %9 : vector<2x32xf32>
    %141 = vector.extract_strided_slice %138 {offsets = [0, 0], sizes = [2, 32], strides = [1, 1]} : vector<2x48xf32> to vector<2x32xf32>
    %142 = arith.addf %140, %141 : vector<2x32xf32>
    %143 = arith.negf %142 : vector<2x32xf32>
    %144 = math.exp %143 : vector<2x32xf32>
    %cst_31 = arith.constant 1.000000e+00 : f32
    %145 = vector.broadcast %cst_31 : f32 to vector<2x32xf32>
    %146 = arith.addf %145, %144 : vector<2x32xf32>
    %147 = arith.divf %145, %146 : vector<2x32xf32>
    %148 = vector.extract_strided_slice %147 {offsets = [0, 0], sizes = [2, 16], strides = [1, 1]} : vector<2x32xf32> to vector<2x16xf32>
    %149 = vector.extract_strided_slice %147 {offsets = [0, 16], sizes = [2, 16], strides = [1, 1]} : vector<2x32xf32> to vector<2x16xf32>
    %150 = vector.extract_strided_slice %136 {offsets = [0, 32], sizes = [2, 16], strides = [1, 1]} : vector<2x48xf32> to vector<2x16xf32>
    %151 = arith.addf %150, %10 : vector<2x16xf32>
    %152 = vector.extract_strided_slice %138 {offsets = [0, 32], sizes = [2, 16], strides = [1, 1]} : vector<2x48xf32> to vector<2x16xf32>
    %153 = vector.broadcast %11 : vector<1x16xf32> to vector<2x16xf32>
    %154 = arith.addf %152, %153 : vector<2x16xf32>
    %155 = arith.mulf %148, %154 : vector<2x16xf32>
    %156 = arith.addf %151, %155 : vector<2x16xf32>
    %157 = math.tanh %156 : vector<2x16xf32>
    %cst_32 = arith.constant 1.000000e+00 : f32
    %158 = vector.broadcast %cst_32 : f32 to vector<2x16xf32>
    %159 = arith.subf %158, %149 : vector<2x16xf32>
    %160 = arith.mulf %159, %157 : vector<2x16xf32>
    %161 = arith.mulf %149, %132 : vector<2x16xf32>
    %162 = arith.addf %160, %161 : vector<2x16xf32>
    %c5_i32 = arith.constant 5 : i32
    %163 = arith.index_cast %c5_i32 : i32 to index
    %c0_33 = arith.constant 0 : index
    %c0_34 = arith.constant 0 : index
    %164 = vector.load %arg2[%163, %c0_33, %c0_34] : memref<8x2x48xbf16, #tpu.memory_space<vmem>>, vector<1x2x48xbf16>
    %165 = vector.shape_cast %164 : vector<1x2x48xbf16> to vector<2x48xbf16>
    %166 = arith.extf %165 : vector<2x48xbf16> to vector<2x48xf32>
    %167 = arith.truncf %162 : vector<2x16xf32> to vector<2x16xbf16>
    %cst_35 = arith.constant dense<0.000000e+00> : vector<2x48xf32>
    %168 = tpu.matmul %167, %3, %cst_35 {dimension_numbers = #tpu.dot_dimension_numbers<[1], [0], [0], [1], [0, 0, 1, 1], [], []>} : vector<2x16xbf16>, vector<16x48xbf16>, vector<2x48xf32> -> vector<2x48xf32>
    %169 = vector.extract_strided_slice %166 {offsets = [0, 0], sizes = [2, 32], strides = [1, 1]} : vector<2x48xf32> to vector<2x32xf32>
    %170 = arith.addf %169, %9 : vector<2x32xf32>
    %171 = vector.extract_strided_slice %168 {offsets = [0, 0], sizes = [2, 32], strides = [1, 1]} : vector<2x48xf32> to vector<2x32xf32>
    %172 = arith.addf %170, %171 : vector<2x32xf32>
    %173 = arith.negf %172 : vector<2x32xf32>
    %174 = math.exp %173 : vector<2x32xf32>
    %cst_36 = arith.constant 1.000000e+00 : f32
    %175 = vector.broadcast %cst_36 : f32 to vector<2x32xf32>
    %176 = arith.addf %175, %174 : vector<2x32xf32>
    %177 = arith.divf %175, %176 : vector<2x32xf32>
    %178 = vector.extract_strided_slice %177 {offsets = [0, 0], sizes = [2, 16], strides = [1, 1]} : vector<2x32xf32> to vector<2x16xf32>
    %179 = vector.extract_strided_slice %177 {offsets = [0, 16], sizes = [2, 16], strides = [1, 1]} : vector<2x32xf32> to vector<2x16xf32>
    %180 = vector.extract_strided_slice %166 {offsets = [0, 32], sizes = [2, 16], strides = [1, 1]} : vector<2x48xf32> to vector<2x16xf32>
    %181 = arith.addf %180, %10 : vector<2x16xf32>
    %182 = vector.extract_strided_slice %168 {offsets = [0, 32], sizes = [2, 16], strides = [1, 1]} : vector<2x48xf32> to vector<2x16xf32>
    %183 = vector.broadcast %11 : vector<1x16xf32> to vector<2x16xf32>
    %184 = arith.addf %182, %183 : vector<2x16xf32>
    %185 = arith.mulf %178, %184 : vector<2x16xf32>
    %186 = arith.addf %181, %185 : vector<2x16xf32>
    %187 = math.tanh %186 : vector<2x16xf32>
    %cst_37 = arith.constant 1.000000e+00 : f32
    %188 = vector.broadcast %cst_37 : f32 to vector<2x16xf32>
    %189 = arith.subf %188, %179 : vector<2x16xf32>
    %190 = arith.mulf %189, %187 : vector<2x16xf32>
    %191 = arith.mulf %179, %162 : vector<2x16xf32>
    %192 = arith.addf %190, %191 : vector<2x16xf32>
    %c6_i32 = arith.constant 6 : i32
    %193 = arith.index_cast %c6_i32 : i32 to index
    %c0_38 = arith.constant 0 : index
    %c0_39 = arith.constant 0 : index
    %194 = vector.load %arg2[%193, %c0_38, %c0_39] : memref<8x2x48xbf16, #tpu.memory_space<vmem>>, vector<1x2x48xbf16>
    %195 = vector.shape_cast %194 : vector<1x2x48xbf16> to vector<2x48xbf16>
    %196 = arith.extf %195 : vector<2x48xbf16> to vector<2x48xf32>
    %197 = arith.truncf %192 : vector<2x16xf32> to vector<2x16xbf16>
    %cst_40 = arith.constant dense<0.000000e+00> : vector<2x48xf32>
    %198 = tpu.matmul %197, %3, %cst_40 {dimension_numbers = #tpu.dot_dimension_numbers<[1], [0], [0], [1], [0, 0, 1, 1], [], []>} : vector<2x16xbf16>, vector<16x48xbf16>, vector<2x48xf32> -> vector<2x48xf32>
    %199 = vector.extract_strided_slice %196 {offsets = [0, 0], sizes = [2, 32], strides = [1, 1]} : vector<2x48xf32> to vector<2x32xf32>
    %200 = arith.addf %199, %9 : vector<2x32xf32>
    %201 = vector.extract_strided_slice %198 {offsets = [0, 0], sizes = [2, 32], strides = [1, 1]} : vector<2x48xf32> to vector<2x32xf32>
    %202 = arith.addf %200, %201 : vector<2x32xf32>
    %203 = arith.negf %202 : vector<2x32xf32>
    %204 = math.exp %203 : vector<2x32xf32>
    %cst_41 = arith.constant 1.000000e+00 : f32
    %205 = vector.broadcast %cst_41 : f32 to vector<2x32xf32>
    %206 = arith.addf %205, %204 : vector<2x32xf32>
    %207 = arith.divf %205, %206 : vector<2x32xf32>
    %208 = vector.extract_strided_slice %207 {offsets = [0, 0], sizes = [2, 16], strides = [1, 1]} : vector<2x32xf32> to vector<2x16xf32>
    %209 = vector.extract_strided_slice %207 {offsets = [0, 16], sizes = [2, 16], strides = [1, 1]} : vector<2x32xf32> to vector<2x16xf32>
    %210 = vector.extract_strided_slice %196 {offsets = [0, 32], sizes = [2, 16], strides = [1, 1]} : vector<2x48xf32> to vector<2x16xf32>
    %211 = arith.addf %210, %10 : vector<2x16xf32>
    %212 = vector.extract_strided_slice %198 {offsets = [0, 32], sizes = [2, 16], strides = [1, 1]} : vector<2x48xf32> to vector<2x16xf32>
    %213 = vector.broadcast %11 : vector<1x16xf32> to vector<2x16xf32>
    %214 = arith.addf %212, %213 : vector<2x16xf32>
    %215 = arith.mulf %208, %214 : vector<2x16xf32>
    %216 = arith.addf %211, %215 : vector<2x16xf32>
    %217 = math.tanh %216 : vector<2x16xf32>
    %cst_42 = arith.constant 1.000000e+00 : f32
    %218 = vector.broadcast %cst_42 : f32 to vector<2x16xf32>
    %219 = arith.subf %218, %209 : vector<2x16xf32>
    %220 = arith.mulf %219, %217 : vector<2x16xf32>
    %221 = arith.mulf %209, %192 : vector<2x16xf32>
    %222 = arith.addf %220, %221 : vector<2x16xf32>
    %c7_i32 = arith.constant 7 : i32
    %223 = arith.index_cast %c7_i32 : i32 to index
    %c0_43 = arith.constant 0 : index
    %c0_44 = arith.constant 0 : index
    %224 = vector.load %arg2[%223, %c0_43, %c0_44] : memref<8x2x48xbf16, #tpu.memory_space<vmem>>, vector<1x2x48xbf16>
    %225 = vector.shape_cast %224 : vector<1x2x48xbf16> to vector<2x48xbf16>
    %226 = arith.extf %225 : vector<2x48xbf16> to vector<2x48xf32>
    %227 = arith.truncf %222 : vector<2x16xf32> to vector<2x16xbf16>
    %cst_45 = arith.constant dense<0.000000e+00> : vector<2x48xf32>
    %228 = tpu.matmul %227, %3, %cst_45 {dimension_numbers = #tpu.dot_dimension_numbers<[1], [0], [0], [1], [0, 0, 1, 1], [], []>} : vector<2x16xbf16>, vector<16x48xbf16>, vector<2x48xf32> -> vector<2x48xf32>
    %229 = vector.extract_strided_slice %226 {offsets = [0, 0], sizes = [2, 32], strides = [1, 1]} : vector<2x48xf32> to vector<2x32xf32>
    %230 = arith.addf %229, %9 : vector<2x32xf32>
    %231 = vector.extract_strided_slice %228 {offsets = [0, 0], sizes = [2, 32], strides = [1, 1]} : vector<2x48xf32> to vector<2x32xf32>
    %232 = arith.addf %230, %231 : vector<2x32xf32>
    %233 = arith.negf %232 : vector<2x32xf32>
    %234 = math.exp %233 : vector<2x32xf32>
    %cst_46 = arith.constant 1.000000e+00 : f32
    %235 = vector.broadcast %cst_46 : f32 to vector<2x32xf32>
    %236 = arith.addf %235, %234 : vector<2x32xf32>
    %237 = arith.divf %235, %236 : vector<2x32xf32>
    %238 = vector.extract_strided_slice %237 {offsets = [0, 0], sizes = [2, 16], strides = [1, 1]} : vector<2x32xf32> to vector<2x16xf32>
    %239 = vector.extract_strided_slice %237 {offsets = [0, 16], sizes = [2, 16], strides = [1, 1]} : vector<2x32xf32> to vector<2x16xf32>
    %240 = vector.extract_strided_slice %226 {offsets = [0, 32], sizes = [2, 16], strides = [1, 1]} : vector<2x48xf32> to vector<2x16xf32>
    %241 = arith.addf %240, %10 : vector<2x16xf32>
    %242 = vector.extract_strided_slice %228 {offsets = [0, 32], sizes = [2, 16], strides = [1, 1]} : vector<2x48xf32> to vector<2x16xf32>
    %243 = vector.broadcast %11 : vector<1x16xf32> to vector<2x16xf32>
    %244 = arith.addf %242, %243 : vector<2x16xf32>
    %245 = arith.mulf %238, %244 : vector<2x16xf32>
    %246 = arith.addf %241, %245 : vector<2x16xf32>
    %247 = math.tanh %246 : vector<2x16xf32>
    %cst_47 = arith.constant 1.000000e+00 : f32
    %248 = vector.broadcast %cst_47 : f32 to vector<2x16xf32>
    %249 = arith.subf %248, %239 : vector<2x16xf32>
    %250 = arith.mulf %249, %247 : vector<2x16xf32>
    %251 = arith.mulf %239, %222 : vector<2x16xf32>
    %252 = arith.addf %250, %251 : vector<2x16xf32>
    %c8_i32 = arith.constant 8 : i32
    %c0_48 = arith.constant 0 : index
    %c0_49 = arith.constant 0 : index
    %253 = vector.load %arg8[%c0_48, %c0_49] : memref<2x16xf32, #tpu.memory_space<vmem>>, vector<2x16xf32>
    tpu.vector_store %arg8[%c0_48, %c0_49], %252 {strides = array<i32>} : memref<2x16xf32, #tpu.memory_space<vmem>>, vector<2x16xf32>,
    %c0_i32_50 = arith.constant 0 : i32
    %254 = arith.cmpi eq, %arg1, %c0_i32_50 : i32
    %255 = arith.extui %254 : i1 to i32
    %c0_i32_51 = arith.constant 0 : i32
    %256 = arith.cmpi ne, %255, %c0_i32_51 : i32
    scf.if %256 {
      %c0_52 = arith.constant 0 : index
      %c0_53 = arith.constant 0 : index
      %257 = vector.load %arg7[%c0_52, %c0_53] : memref<2x16xf32, #tpu.memory_space<vmem>>, vector<2x16xf32>
      tpu.vector_store %arg7[%c0_52, %c0_53], %252 {strides = array<i32>} : memref<2x16xf32, #tpu.memory_space<vmem>>, vector<2x16xf32>,
    } else {
    }
    return
  }
  func.func @transform_0(%arg0: i32, %arg1: i32) -> (i32, i32, i32) {
    %c0_i32 = arith.constant 0 : i32
    %c0_i32_0 = arith.constant 0 : i32
    return %arg1, %arg0, %c0_i32 : i32, i32, i32
  }
  func.func @transform_1(%arg0: i32, %arg1: i32) -> (i32, i32) {
    %c0_i32 = arith.constant 0 : i32
    %c0_i32_0 = arith.constant 0 : i32
    return %arg0, %c0_i32 : i32, i32
  }
  func.func @transform_2(%arg0: i32, %arg1: i32) -> (i32, i32) {
    %c0_i32 = arith.constant 0 : i32
    %c0_i32_0 = arith.constant 0 : i32
    %c0_i32_1 = arith.constant 0 : i32
    return %c0_i32, %c0_i32_0 : i32, i32
  }
  func.func @transform_3(%arg0: i32, %arg1: i32) -> (i32, i32) {
    %c0_i32 = arith.constant 0 : i32
    %c0_i32_0 = arith.constant 0 : i32
    %c0_i32_1 = arith.constant 0 : i32
    return %c0_i32, %c0_i32_0 : i32, i32
  }
  func.func @transform_4(%arg0: i32, %arg1: i32) -> (i32, i32) {
    %c0_i32 = arith.constant 0 : i32
    %c0_i32_0 = arith.constant 0 : i32
    return %arg0, %c0_i32 : i32, i32
  }
  func.func @transform_5(%arg0: i32, %arg1: i32) -> (i32, i32) {
    %c0_i32 = arith.constant 0 : i32
    %c0_i32_0 = arith.constant 0 : i32
    return %arg0, %c0_i32 : i32, i32
  }
}

module attributes {stable_mosaic.version = 11 : i64} {
  func.func @dense_head_kernel(%arg0: i32, %arg1: i32, %arg2: i32, %arg3: memref<8x2x16xbf16, #tpu.memory_space<vmem>>, %arg4: memref<16x16xbf16, #tpu.memory_space<vmem>>, %arg5: memref<1x16xf32, #tpu.memory_space<vmem>>, %arg6: memref<2x8x16xf32, #tpu.memory_space<vmem>>) attributes {dimension_semantics = [#tpu.dimension_semantics<parallel>, #tpu.dimension_semantics<parallel>, #tpu.dimension_semantics<parallel>], iteration_bounds = array<i64: 1, 1, 1>, scalar_prefetch = 0 : i64, scratch_operands = 0 : i64, tpu.core_type = #tpu.core_type<tc>, window_params = [{transform_indices = @transform_0, window_bounds = array<i64: 8, 2, 16>}, {transform_indices = @transform_1, window_bounds = array<i64: 16, 16>}, {transform_indices = @transform_2, window_bounds = array<i64: 1, 16>}, {transform_indices = @transform_3, window_bounds = array<i64: 2, 8, 16>}]} {
    %c0 = arith.constant 0 : index
    %c0_0 = arith.constant 0 : index
    %0 = vector.load %arg4[%c0, %c0_0] : memref<16x16xbf16, #tpu.memory_space<vmem>>, vector<16x16xbf16>
    %c0_1 = arith.constant 0 : index
    %c0_2 = arith.constant 0 : index
    %1 = vector.load %arg5[%c0_1, %c0_2] : memref<1x16xf32, #tpu.memory_space<vmem>>, vector<1x16xf32>
    %c0_3 = arith.constant 0 : index
    %c0_4 = arith.constant 0 : index
    %c0_5 = arith.constant 0 : index
    %2 = vector.load %arg3[%c0_3, %c0_4, %c0_5] : memref<8x2x16xbf16, #tpu.memory_space<vmem>>, vector<8x1x16xbf16>
    %3 = vector.shape_cast %2 : vector<8x1x16xbf16> to vector<8x16xbf16>
    %cst = arith.constant dense<0.000000e+00> : vector<8x16xf32>
    %4 = tpu.matmul %3, %0, %cst {dimension_numbers = #tpu.dot_dimension_numbers<[1], [0], [0], [1], [0, 0, 1, 1], [], []>} : vector<8x16xbf16>, vector<16x16xbf16>, vector<8x16xf32> -> vector<8x16xf32>
    %5 = vector.broadcast %1 : vector<1x16xf32> to vector<8x16xf32>
    %6 = arith.addf %4, %5 : vector<8x16xf32>
    %c0_6 = arith.constant 0 : index
    %c0_7 = arith.constant 0 : index
    %c0_8 = arith.constant 0 : index
    %7 = vector.load %arg6[%c0_6, %c0_7, %c0_8] : memref<2x8x16xf32, #tpu.memory_space<vmem>>, vector<1x8x16xf32>
    %8 = vector.shape_cast %7 : vector<1x8x16xf32> to vector<8x16xf32>
    %9 = vector.shape_cast %6 : vector<8x16xf32> to vector<1x8x16xf32>
    tpu.vector_store %arg6[%c0_6, %c0_7, %c0_8], %9 {strides = array<i32>} : memref<2x8x16xf32, #tpu.memory_space<vmem>>, vector<1x8x16xf32>,
    %c0_9 = arith.constant 0 : index
    %c1 = arith.constant 1 : index
    %c0_10 = arith.constant 0 : index
    %10 = vector.load %arg3[%c0_9, %c1, %c0_10] : memref<8x2x16xbf16, #tpu.memory_space<vmem>>, vector<8x1x16xbf16>
    %11 = vector.shape_cast %10 : vector<8x1x16xbf16> to vector<8x16xbf16>
    %cst_11 = arith.constant dense<0.000000e+00> : vector<8x16xf32>
    %12 = tpu.matmul %11, %0, %cst_11 {dimension_numbers = #tpu.dot_dimension_numbers<[1], [0], [0], [1], [0, 0, 1, 1], [], []>} : vector<8x16xbf16>, vector<16x16xbf16>, vector<8x16xf32> -> vector<8x16xf32>
    %13 = vector.broadcast %1 : vector<1x16xf32> to vector<8x16xf32>
    %14 = arith.addf %12, %13 : vector<8x16xf32>
    %c1_12 = arith.constant 1 : index
    %c0_13 = arith.constant 0 : index
    %c0_14 = arith.constant 0 : index
    %15 = vector.load %arg6[%c1_12, %c0_13, %c0_14] : memref<2x8x16xf32, #tpu.memory_space<vmem>>, vector<1x8x16xf32>
    %16 = vector.shape_cast %15 : vector<1x8x16xf32> to vector<8x16xf32>
    %17 = vector.shape_cast %14 : vector<8x16xf32> to vector<1x8x16xf32>
    tpu.vector_store %arg6[%c1_12, %c0_13, %c0_14], %17 {strides = array<i32>} : memref<2x8x16xf32, #tpu.memory_space<vmem>>, vector<1x8x16xf32>,
    return
  }
  func.func @transform_0(%arg0: i32, %arg1: i32, %arg2: i32) -> (i32, i32, i32) {
    %c0_i32 = arith.constant 0 : i32
    %c0_i32_0 = arith.constant 0 : i32
    return %arg1, %arg0, %c0_i32 : i32, i32, i32
  }
  func.func @transform_1(%arg0: i32, %arg1: i32, %arg2: i32) -> (i32, i32) {
    %c0_i32 = arith.constant 0 : i32
    %c0_i32_0 = arith.constant 0 : i32
    return %c0_i32, %arg2 : i32, i32
  }
  func.func @transform_2(%arg0: i32, %arg1: i32, %arg2: i32) -> (i32, i32) {
    %c0_i32 = arith.constant 0 : i32
    %c0_i32_0 = arith.constant 0 : i32
    return %c0_i32, %arg2 : i32, i32
  }
  func.func @transform_3(%arg0: i32, %arg1: i32, %arg2: i32) -> (i32, i32, i32) {
    %c0_i32 = arith.constant 0 : i32
    return %arg0, %arg1, %arg2 : i32, i32, i32
  }
}

module attributes {stable_mosaic.version = 11 : i64} {
  func.func @gru_kernel_seq(%arg0: i32, %arg1: i32, %arg2: memref<8x2x48xbf16, #tpu.memory_space<vmem>>, %arg3: memref<2x48xf32, #tpu.memory_space<vmem>>, %arg4: memref<16x48xbf16, #tpu.memory_space<vmem>>, %arg5: memref<1x48xf32, #tpu.memory_space<vmem>>, %arg6: memref<2x16xf32, #tpu.memory_space<vmem>>, %arg7: memref<8x2x16xbf16, #tpu.memory_space<vmem>>, %arg8: memref<2x16xf32, #tpu.memory_space<vmem>>, %arg9: memref<2x16xf32, #tpu.memory_space<vmem>>) attributes {dimension_semantics = [#tpu.dimension_semantics<parallel>, #tpu.dimension_semantics<arbitrary>], iteration_bounds = array<i64: 1, 1>, scalar_prefetch = 0 : i64, scratch_operands = 1 : i64, tpu.core_type = #tpu.core_type<tc>, window_params = [{transform_indices = @transform_0, window_bounds = array<i64: 8, 2, 48>}, {transform_indices = @transform_1, window_bounds = array<i64: 2, 48>}, {pipeline_mode = #tpu.pipeline_mode<synchronous>, transform_indices = @transform_2, window_bounds = array<i64: 16, 48>}, {pipeline_mode = #tpu.pipeline_mode<synchronous>, transform_indices = @transform_3, window_bounds = array<i64: 1, 48>}, {transform_indices = @transform_4, window_bounds = array<i64: 2, 16>}, {transform_indices = @transform_5, window_bounds = array<i64: 8, 2, 16>}, {transform_indices = @transform_6, window_bounds = array<i64: 2, 16>}]} {
    %c0_i32 = arith.constant 0 : i32
    %0 = arith.cmpi eq, %arg1, %c0_i32 : i32
    %1 = arith.extui %0 : i1 to i32
    %c0_i32_0 = arith.constant 0 : i32
    %2 = arith.cmpi ne, %1, %c0_i32_0 : i32
    scf.if %2 {
      %c0_68 = arith.constant 0 : index
      %c0_69 = arith.constant 0 : index
      %297 = vector.load %arg6[%c0_68, %c0_69] : memref<2x16xf32, #tpu.memory_space<vmem>>, vector<2x16xf32>
      %c0_70 = arith.constant 0 : index
      %c0_71 = arith.constant 0 : index
      %298 = vector.load %arg9[%c0_70, %c0_71] : memref<2x16xf32, #tpu.memory_space<vmem>>, vector<2x16xf32>
      tpu.vector_store %arg9[%c0_70, %c0_71], %297 {strides = array<i32>} : memref<2x16xf32, #tpu.memory_space<vmem>>, vector<2x16xf32>,
    } else {
    }
    %c0 = arith.constant 0 : index
    %c0_1 = arith.constant 0 : index
    %3 = vector.load %arg4[%c0, %c0_1] : memref<16x48xbf16, #tpu.memory_space<vmem>>, vector<16x48xbf16>
    %c0_2 = arith.constant 0 : index
    %c0_3 = arith.constant 0 : index
    %4 = vector.load %arg5[%c0_2, %c0_3] : memref<1x48xf32, #tpu.memory_space<vmem>>, vector<1x48xf32>
    %c0_4 = arith.constant 0 : index
    %c0_5 = arith.constant 0 : index
    %5 = vector.load %arg3[%c0_4, %c0_5] : memref<2x48xf32, #tpu.memory_space<vmem>>, vector<2x48xf32>
    %6 = vector.extract_strided_slice %5 {offsets = [0, 0], sizes = [2, 32], strides = [1, 1]} : vector<2x48xf32> to vector<2x32xf32>
    %7 = vector.extract_strided_slice %4 {offsets = [0, 0], sizes = [1, 32], strides = [1, 1]} : vector<1x48xf32> to vector<1x32xf32>
    %8 = vector.broadcast %7 : vector<1x32xf32> to vector<2x32xf32>
    %9 = arith.addf %6, %8 : vector<2x32xf32>
    %10 = vector.extract_strided_slice %5 {offsets = [0, 32], sizes = [2, 16], strides = [1, 1]} : vector<2x48xf32> to vector<2x16xf32>
    %11 = vector.extract_strided_slice %4 {offsets = [0, 32], sizes = [1, 16], strides = [1, 1]} : vector<1x48xf32> to vector<1x16xf32>
    %c0_6 = arith.constant 0 : index
    %c0_7 = arith.constant 0 : index
    %12 = vector.load %arg9[%c0_6, %c0_7] : memref<2x16xf32, #tpu.memory_space<vmem>>, vector<2x16xf32>
    %c0_i32_8 = arith.constant 0 : i32
    %13 = arith.index_cast %c0_i32_8 : i32 to index
    %c0_9 = arith.constant 0 : index
    %c0_10 = arith.constant 0 : index
    %14 = vector.load %arg2[%13, %c0_9, %c0_10] : memref<8x2x48xbf16, #tpu.memory_space<vmem>>, vector<1x2x48xbf16>
    %15 = vector.shape_cast %14 : vector<1x2x48xbf16> to vector<2x48xbf16>
    %16 = arith.extf %15 : vector<2x48xbf16> to vector<2x48xf32>
    %17 = arith.truncf %12 : vector<2x16xf32> to vector<2x16xbf16>
    %cst = arith.constant dense<0.000000e+00> : vector<2x48xf32>
    %18 = tpu.matmul %17, %3, %cst {dimension_numbers = #tpu.dot_dimension_numbers<[1], [0], [0], [1], [0, 0, 1, 1], [], []>} : vector<2x16xbf16>, vector<16x48xbf16>, vector<2x48xf32> -> vector<2x48xf32>
    %19 = vector.extract_strided_slice %16 {offsets = [0, 0], sizes = [2, 32], strides = [1, 1]} : vector<2x48xf32> to vector<2x32xf32>
    %20 = arith.addf %19, %9 : vector<2x32xf32>
    %21 = vector.extract_strided_slice %18 {offsets = [0, 0], sizes = [2, 32], strides = [1, 1]} : vector<2x48xf32> to vector<2x32xf32>
    %22 = arith.addf %20, %21 : vector<2x32xf32>
    %23 = arith.negf %22 : vector<2x32xf32>
    %24 = math.exp %23 : vector<2x32xf32>
    %cst_11 = arith.constant 1.000000e+00 : f32
    %25 = vector.broadcast %cst_11 : f32 to vector<2x32xf32>
    %26 = arith.addf %25, %24 : vector<2x32xf32>
    %27 = arith.divf %25, %26 : vector<2x32xf32>
    %28 = vector.extract_strided_slice %27 {offsets = [0, 0], sizes = [2, 16], strides = [1, 1]} : vector<2x32xf32> to vector<2x16xf32>
    %29 = vector.extract_strided_slice %27 {offsets = [0, 16], sizes = [2, 16], strides = [1, 1]} : vector<2x32xf32> to vector<2x16xf32>
    %30 = vector.extract_strided_slice %16 {offsets = [0, 32], sizes = [2, 16], strides = [1, 1]} : vector<2x48xf32> to vector<2x16xf32>
    %31 = arith.addf %30, %10 : vector<2x16xf32>
    %32 = vector.extract_strided_slice %18 {offsets = [0, 32], sizes = [2, 16], strides = [1, 1]} : vector<2x48xf32> to vector<2x16xf32>
    %33 = vector.broadcast %11 : vector<1x16xf32> to vector<2x16xf32>
    %34 = arith.addf %32, %33 : vector<2x16xf32>
    %35 = arith.mulf %28, %34 : vector<2x16xf32>
    %36 = arith.addf %31, %35 : vector<2x16xf32>
    %37 = math.tanh %36 : vector<2x16xf32>
    %cst_12 = arith.constant 1.000000e+00 : f32
    %38 = vector.broadcast %cst_12 : f32 to vector<2x16xf32>
    %39 = arith.subf %38, %29 : vector<2x16xf32>
    %40 = arith.mulf %39, %37 : vector<2x16xf32>
    %41 = arith.mulf %29, %12 : vector<2x16xf32>
    %42 = arith.addf %40, %41 : vector<2x16xf32>
    %43 = arith.truncf %42 : vector<2x16xf32> to vector<2x16xbf16>
    %44 = arith.index_cast %c0_i32_8 : i32 to index
    %c0_13 = arith.constant 0 : index
    %c0_14 = arith.constant 0 : index
    %45 = vector.load %arg7[%44, %c0_13, %c0_14] : memref<8x2x16xbf16, #tpu.memory_space<vmem>>, vector<1x2x16xbf16>
    %46 = vector.shape_cast %45 : vector<1x2x16xbf16> to vector<2x16xbf16>
    %47 = vector.shape_cast %43 : vector<2x16xbf16> to vector<1x2x16xbf16>
    tpu.vector_store %arg7[%44, %c0_13, %c0_14], %47 {strides = array<i32>} : memref<8x2x16xbf16, #tpu.memory_space<vmem>>, vector<1x2x16xbf16>,
    %c1_i32 = arith.constant 1 : i32
    %48 = arith.index_cast %c1_i32 : i32 to index
    %c0_15 = arith.constant 0 : index
    %c0_16 = arith.constant 0 : index
    %49 = vector.load %arg2[%48, %c0_15, %c0_16] : memref<8x2x48xbf16, #tpu.memory_space<vmem>>, vector<1x2x48xbf16>
    %50 = vector.shape_cast %49 : vector<1x2x48xbf16> to vector<2x48xbf16>
    %51 = arith.extf %50 : vector<2x48xbf16> to vector<2x48xf32>
    %52 = arith.truncf %42 : vector<2x16xf32> to vector<2x16xbf16>
    %cst_17 = arith.constant dense<0.000000e+00> : vector<2x48xf32>
    %53 = tpu.matmul %52, %3, %cst_17 {dimension_numbers = #tpu.dot_dimension_numbers<[1], [0], [0], [1], [0, 0, 1, 1], [], []>} : vector<2x16xbf16>, vector<16x48xbf16>, vector<2x48xf32> -> vector<2x48xf32>
    %54 = vector.extract_strided_slice %51 {offsets = [0, 0], sizes = [2, 32], strides = [1, 1]} : vector<2x48xf32> to vector<2x32xf32>
    %55 = arith.addf %54, %9 : vector<2x32xf32>
    %56 = vector.extract_strided_slice %53 {offsets = [0, 0], sizes = [2, 32], strides = [1, 1]} : vector<2x48xf32> to vector<2x32xf32>
    %57 = arith.addf %55, %56 : vector<2x32xf32>
    %58 = arith.negf %57 : vector<2x32xf32>
    %59 = math.exp %58 : vector<2x32xf32>
    %cst_18 = arith.constant 1.000000e+00 : f32
    %60 = vector.broadcast %cst_18 : f32 to vector<2x32xf32>
    %61 = arith.addf %60, %59 : vector<2x32xf32>
    %62 = arith.divf %60, %61 : vector<2x32xf32>
    %63 = vector.extract_strided_slice %62 {offsets = [0, 0], sizes = [2, 16], strides = [1, 1]} : vector<2x32xf32> to vector<2x16xf32>
    %64 = vector.extract_strided_slice %62 {offsets = [0, 16], sizes = [2, 16], strides = [1, 1]} : vector<2x32xf32> to vector<2x16xf32>
    %65 = vector.extract_strided_slice %51 {offsets = [0, 32], sizes = [2, 16], strides = [1, 1]} : vector<2x48xf32> to vector<2x16xf32>
    %66 = arith.addf %65, %10 : vector<2x16xf32>
    %67 = vector.extract_strided_slice %53 {offsets = [0, 32], sizes = [2, 16], strides = [1, 1]} : vector<2x48xf32> to vector<2x16xf32>
    %68 = vector.broadcast %11 : vector<1x16xf32> to vector<2x16xf32>
    %69 = arith.addf %67, %68 : vector<2x16xf32>
    %70 = arith.mulf %63, %69 : vector<2x16xf32>
    %71 = arith.addf %66, %70 : vector<2x16xf32>
    %72 = math.tanh %71 : vector<2x16xf32>
    %cst_19 = arith.constant 1.000000e+00 : f32
    %73 = vector.broadcast %cst_19 : f32 to vector<2x16xf32>
    %74 = arith.subf %73, %64 : vector<2x16xf32>
    %75 = arith.mulf %74, %72 : vector<2x16xf32>
    %76 = arith.mulf %64, %42 : vector<2x16xf32>
    %77 = arith.addf %75, %76 : vector<2x16xf32>
    %78 = arith.truncf %77 : vector<2x16xf32> to vector<2x16xbf16>
    %79 = arith.index_cast %c1_i32 : i32 to index
    %c0_20 = arith.constant 0 : index
    %c0_21 = arith.constant 0 : index
    %80 = vector.load %arg7[%79, %c0_20, %c0_21] : memref<8x2x16xbf16, #tpu.memory_space<vmem>>, vector<1x2x16xbf16>
    %81 = vector.shape_cast %80 : vector<1x2x16xbf16> to vector<2x16xbf16>
    %82 = vector.shape_cast %78 : vector<2x16xbf16> to vector<1x2x16xbf16>
    tpu.vector_store %arg7[%79, %c0_20, %c0_21], %82 {strides = array<i32>} : memref<8x2x16xbf16, #tpu.memory_space<vmem>>, vector<1x2x16xbf16>,
    %c2_i32 = arith.constant 2 : i32
    %83 = arith.index_cast %c2_i32 : i32 to index
    %c0_22 = arith.constant 0 : index
    %c0_23 = arith.constant 0 : index
    %84 = vector.load %arg2[%83, %c0_22, %c0_23] : memref<8x2x48xbf16, #tpu.memory_space<vmem>>, vector<1x2x48xbf16>
    %85 = vector.shape_cast %84 : vector<1x2x48xbf16> to vector<2x48xbf16>
    %86 = arith.extf %85 : vector<2x48xbf16> to vector<2x48xf32>
    %87 = arith.truncf %77 : vector<2x16xf32> to vector<2x16xbf16>
    %cst_24 = arith.constant dense<0.000000e+00> : vector<2x48xf32>
    %88 = tpu.matmul %87, %3, %cst_24 {dimension_numbers = #tpu.dot_dimension_numbers<[1], [0], [0], [1], [0, 0, 1, 1], [], []>} : vector<2x16xbf16>, vector<16x48xbf16>, vector<2x48xf32> -> vector<2x48xf32>
    %89 = vector.extract_strided_slice %86 {offsets = [0, 0], sizes = [2, 32], strides = [1, 1]} : vector<2x48xf32> to vector<2x32xf32>
    %90 = arith.addf %89, %9 : vector<2x32xf32>
    %91 = vector.extract_strided_slice %88 {offsets = [0, 0], sizes = [2, 32], strides = [1, 1]} : vector<2x48xf32> to vector<2x32xf32>
    %92 = arith.addf %90, %91 : vector<2x32xf32>
    %93 = arith.negf %92 : vector<2x32xf32>
    %94 = math.exp %93 : vector<2x32xf32>
    %cst_25 = arith.constant 1.000000e+00 : f32
    %95 = vector.broadcast %cst_25 : f32 to vector<2x32xf32>
    %96 = arith.addf %95, %94 : vector<2x32xf32>
    %97 = arith.divf %95, %96 : vector<2x32xf32>
    %98 = vector.extract_strided_slice %97 {offsets = [0, 0], sizes = [2, 16], strides = [1, 1]} : vector<2x32xf32> to vector<2x16xf32>
    %99 = vector.extract_strided_slice %97 {offsets = [0, 16], sizes = [2, 16], strides = [1, 1]} : vector<2x32xf32> to vector<2x16xf32>
    %100 = vector.extract_strided_slice %86 {offsets = [0, 32], sizes = [2, 16], strides = [1, 1]} : vector<2x48xf32> to vector<2x16xf32>
    %101 = arith.addf %100, %10 : vector<2x16xf32>
    %102 = vector.extract_strided_slice %88 {offsets = [0, 32], sizes = [2, 16], strides = [1, 1]} : vector<2x48xf32> to vector<2x16xf32>
    %103 = vector.broadcast %11 : vector<1x16xf32> to vector<2x16xf32>
    %104 = arith.addf %102, %103 : vector<2x16xf32>
    %105 = arith.mulf %98, %104 : vector<2x16xf32>
    %106 = arith.addf %101, %105 : vector<2x16xf32>
    %107 = math.tanh %106 : vector<2x16xf32>
    %cst_26 = arith.constant 1.000000e+00 : f32
    %108 = vector.broadcast %cst_26 : f32 to vector<2x16xf32>
    %109 = arith.subf %108, %99 : vector<2x16xf32>
    %110 = arith.mulf %109, %107 : vector<2x16xf32>
    %111 = arith.mulf %99, %77 : vector<2x16xf32>
    %112 = arith.addf %110, %111 : vector<2x16xf32>
    %113 = arith.truncf %112 : vector<2x16xf32> to vector<2x16xbf16>
    %114 = arith.index_cast %c2_i32 : i32 to index
    %c0_27 = arith.constant 0 : index
    %c0_28 = arith.constant 0 : index
    %115 = vector.load %arg7[%114, %c0_27, %c0_28] : memref<8x2x16xbf16, #tpu.memory_space<vmem>>, vector<1x2x16xbf16>
    %116 = vector.shape_cast %115 : vector<1x2x16xbf16> to vector<2x16xbf16>
    %117 = vector.shape_cast %113 : vector<2x16xbf16> to vector<1x2x16xbf16>
    tpu.vector_store %arg7[%114, %c0_27, %c0_28], %117 {strides = array<i32>} : memref<8x2x16xbf16, #tpu.memory_space<vmem>>, vector<1x2x16xbf16>,
    %c3_i32 = arith.constant 3 : i32
    %118 = arith.index_cast %c3_i32 : i32 to index
    %c0_29 = arith.constant 0 : index
    %c0_30 = arith.constant 0 : index
    %119 = vector.load %arg2[%118, %c0_29, %c0_30] : memref<8x2x48xbf16, #tpu.memory_space<vmem>>, vector<1x2x48xbf16>
    %120 = vector.shape_cast %119 : vector<1x2x48xbf16> to vector<2x48xbf16>
    %121 = arith.extf %120 : vector<2x48xbf16> to vector<2x48xf32>
    %122 = arith.truncf %112 : vector<2x16xf32> to vector<2x16xbf16>
    %cst_31 = arith.constant dense<0.000000e+00> : vector<2x48xf32>
    %123 = tpu.matmul %122, %3, %cst_31 {dimension_numbers = #tpu.dot_dimension_numbers<[1], [0], [0], [1], [0, 0, 1, 1], [], []>} : vector<2x16xbf16>, vector<16x48xbf16>, vector<2x48xf32> -> vector<2x48xf32>
    %124 = vector.extract_strided_slice %121 {offsets = [0, 0], sizes = [2, 32], strides = [1, 1]} : vector<2x48xf32> to vector<2x32xf32>
    %125 = arith.addf %124, %9 : vector<2x32xf32>
    %126 = vector.extract_strided_slice %123 {offsets = [0, 0], sizes = [2, 32], strides = [1, 1]} : vector<2x48xf32> to vector<2x32xf32>
    %127 = arith.addf %125, %126 : vector<2x32xf32>
    %128 = arith.negf %127 : vector<2x32xf32>
    %129 = math.exp %128 : vector<2x32xf32>
    %cst_32 = arith.constant 1.000000e+00 : f32
    %130 = vector.broadcast %cst_32 : f32 to vector<2x32xf32>
    %131 = arith.addf %130, %129 : vector<2x32xf32>
    %132 = arith.divf %130, %131 : vector<2x32xf32>
    %133 = vector.extract_strided_slice %132 {offsets = [0, 0], sizes = [2, 16], strides = [1, 1]} : vector<2x32xf32> to vector<2x16xf32>
    %134 = vector.extract_strided_slice %132 {offsets = [0, 16], sizes = [2, 16], strides = [1, 1]} : vector<2x32xf32> to vector<2x16xf32>
    %135 = vector.extract_strided_slice %121 {offsets = [0, 32], sizes = [2, 16], strides = [1, 1]} : vector<2x48xf32> to vector<2x16xf32>
    %136 = arith.addf %135, %10 : vector<2x16xf32>
    %137 = vector.extract_strided_slice %123 {offsets = [0, 32], sizes = [2, 16], strides = [1, 1]} : vector<2x48xf32> to vector<2x16xf32>
    %138 = vector.broadcast %11 : vector<1x16xf32> to vector<2x16xf32>
    %139 = arith.addf %137, %138 : vector<2x16xf32>
    %140 = arith.mulf %133, %139 : vector<2x16xf32>
    %141 = arith.addf %136, %140 : vector<2x16xf32>
    %142 = math.tanh %141 : vector<2x16xf32>
    %cst_33 = arith.constant 1.000000e+00 : f32
    %143 = vector.broadcast %cst_33 : f32 to vector<2x16xf32>
    %144 = arith.subf %143, %134 : vector<2x16xf32>
    %145 = arith.mulf %144, %142 : vector<2x16xf32>
    %146 = arith.mulf %134, %112 : vector<2x16xf32>
    %147 = arith.addf %145, %146 : vector<2x16xf32>
    %148 = arith.truncf %147 : vector<2x16xf32> to vector<2x16xbf16>
    %149 = arith.index_cast %c3_i32 : i32 to index
    %c0_34 = arith.constant 0 : index
    %c0_35 = arith.constant 0 : index
    %150 = vector.load %arg7[%149, %c0_34, %c0_35] : memref<8x2x16xbf16, #tpu.memory_space<vmem>>, vector<1x2x16xbf16>
    %151 = vector.shape_cast %150 : vector<1x2x16xbf16> to vector<2x16xbf16>
    %152 = vector.shape_cast %148 : vector<2x16xbf16> to vector<1x2x16xbf16>
    tpu.vector_store %arg7[%149, %c0_34, %c0_35], %152 {strides = array<i32>} : memref<8x2x16xbf16, #tpu.memory_space<vmem>>, vector<1x2x16xbf16>,
    %c4_i32 = arith.constant 4 : i32
    %153 = arith.index_cast %c4_i32 : i32 to index
    %c0_36 = arith.constant 0 : index
    %c0_37 = arith.constant 0 : index
    %154 = vector.load %arg2[%153, %c0_36, %c0_37] : memref<8x2x48xbf16, #tpu.memory_space<vmem>>, vector<1x2x48xbf16>
    %155 = vector.shape_cast %154 : vector<1x2x48xbf16> to vector<2x48xbf16>
    %156 = arith.extf %155 : vector<2x48xbf16> to vector<2x48xf32>
    %157 = arith.truncf %147 : vector<2x16xf32> to vector<2x16xbf16>
    %cst_38 = arith.constant dense<0.000000e+00> : vector<2x48xf32>
    %158 = tpu.matmul %157, %3, %cst_38 {dimension_numbers = #tpu.dot_dimension_numbers<[1], [0], [0], [1], [0, 0, 1, 1], [], []>} : vector<2x16xbf16>, vector<16x48xbf16>, vector<2x48xf32> -> vector<2x48xf32>
    %159 = vector.extract_strided_slice %156 {offsets = [0, 0], sizes = [2, 32], strides = [1, 1]} : vector<2x48xf32> to vector<2x32xf32>
    %160 = arith.addf %159, %9 : vector<2x32xf32>
    %161 = vector.extract_strided_slice %158 {offsets = [0, 0], sizes = [2, 32], strides = [1, 1]} : vector<2x48xf32> to vector<2x32xf32>
    %162 = arith.addf %160, %161 : vector<2x32xf32>
    %163 = arith.negf %162 : vector<2x32xf32>
    %164 = math.exp %163 : vector<2x32xf32>
    %cst_39 = arith.constant 1.000000e+00 : f32
    %165 = vector.broadcast %cst_39 : f32 to vector<2x32xf32>
    %166 = arith.addf %165, %164 : vector<2x32xf32>
    %167 = arith.divf %165, %166 : vector<2x32xf32>
    %168 = vector.extract_strided_slice %167 {offsets = [0, 0], sizes = [2, 16], strides = [1, 1]} : vector<2x32xf32> to vector<2x16xf32>
    %169 = vector.extract_strided_slice %167 {offsets = [0, 16], sizes = [2, 16], strides = [1, 1]} : vector<2x32xf32> to vector<2x16xf32>
    %170 = vector.extract_strided_slice %156 {offsets = [0, 32], sizes = [2, 16], strides = [1, 1]} : vector<2x48xf32> to vector<2x16xf32>
    %171 = arith.addf %170, %10 : vector<2x16xf32>
    %172 = vector.extract_strided_slice %158 {offsets = [0, 32], sizes = [2, 16], strides = [1, 1]} : vector<2x48xf32> to vector<2x16xf32>
    %173 = vector.broadcast %11 : vector<1x16xf32> to vector<2x16xf32>
    %174 = arith.addf %172, %173 : vector<2x16xf32>
    %175 = arith.mulf %168, %174 : vector<2x16xf32>
    %176 = arith.addf %171, %175 : vector<2x16xf32>
    %177 = math.tanh %176 : vector<2x16xf32>
    %cst_40 = arith.constant 1.000000e+00 : f32
    %178 = vector.broadcast %cst_40 : f32 to vector<2x16xf32>
    %179 = arith.subf %178, %169 : vector<2x16xf32>
    %180 = arith.mulf %179, %177 : vector<2x16xf32>
    %181 = arith.mulf %169, %147 : vector<2x16xf32>
    %182 = arith.addf %180, %181 : vector<2x16xf32>
    %183 = arith.truncf %182 : vector<2x16xf32> to vector<2x16xbf16>
    %184 = arith.index_cast %c4_i32 : i32 to index
    %c0_41 = arith.constant 0 : index
    %c0_42 = arith.constant 0 : index
    %185 = vector.load %arg7[%184, %c0_41, %c0_42] : memref<8x2x16xbf16, #tpu.memory_space<vmem>>, vector<1x2x16xbf16>
    %186 = vector.shape_cast %185 : vector<1x2x16xbf16> to vector<2x16xbf16>
    %187 = vector.shape_cast %183 : vector<2x16xbf16> to vector<1x2x16xbf16>
    tpu.vector_store %arg7[%184, %c0_41, %c0_42], %187 {strides = array<i32>} : memref<8x2x16xbf16, #tpu.memory_space<vmem>>, vector<1x2x16xbf16>,
    %c5_i32 = arith.constant 5 : i32
    %188 = arith.index_cast %c5_i32 : i32 to index
    %c0_43 = arith.constant 0 : index
    %c0_44 = arith.constant 0 : index
    %189 = vector.load %arg2[%188, %c0_43, %c0_44] : memref<8x2x48xbf16, #tpu.memory_space<vmem>>, vector<1x2x48xbf16>
    %190 = vector.shape_cast %189 : vector<1x2x48xbf16> to vector<2x48xbf16>
    %191 = arith.extf %190 : vector<2x48xbf16> to vector<2x48xf32>
    %192 = arith.truncf %182 : vector<2x16xf32> to vector<2x16xbf16>
    %cst_45 = arith.constant dense<0.000000e+00> : vector<2x48xf32>
    %193 = tpu.matmul %192, %3, %cst_45 {dimension_numbers = #tpu.dot_dimension_numbers<[1], [0], [0], [1], [0, 0, 1, 1], [], []>} : vector<2x16xbf16>, vector<16x48xbf16>, vector<2x48xf32> -> vector<2x48xf32>
    %194 = vector.extract_strided_slice %191 {offsets = [0, 0], sizes = [2, 32], strides = [1, 1]} : vector<2x48xf32> to vector<2x32xf32>
    %195 = arith.addf %194, %9 : vector<2x32xf32>
    %196 = vector.extract_strided_slice %193 {offsets = [0, 0], sizes = [2, 32], strides = [1, 1]} : vector<2x48xf32> to vector<2x32xf32>
    %197 = arith.addf %195, %196 : vector<2x32xf32>
    %198 = arith.negf %197 : vector<2x32xf32>
    %199 = math.exp %198 : vector<2x32xf32>
    %cst_46 = arith.constant 1.000000e+00 : f32
    %200 = vector.broadcast %cst_46 : f32 to vector<2x32xf32>
    %201 = arith.addf %200, %199 : vector<2x32xf32>
    %202 = arith.divf %200, %201 : vector<2x32xf32>
    %203 = vector.extract_strided_slice %202 {offsets = [0, 0], sizes = [2, 16], strides = [1, 1]} : vector<2x32xf32> to vector<2x16xf32>
    %204 = vector.extract_strided_slice %202 {offsets = [0, 16], sizes = [2, 16], strides = [1, 1]} : vector<2x32xf32> to vector<2x16xf32>
    %205 = vector.extract_strided_slice %191 {offsets = [0, 32], sizes = [2, 16], strides = [1, 1]} : vector<2x48xf32> to vector<2x16xf32>
    %206 = arith.addf %205, %10 : vector<2x16xf32>
    %207 = vector.extract_strided_slice %193 {offsets = [0, 32], sizes = [2, 16], strides = [1, 1]} : vector<2x48xf32> to vector<2x16xf32>
    %208 = vector.broadcast %11 : vector<1x16xf32> to vector<2x16xf32>
    %209 = arith.addf %207, %208 : vector<2x16xf32>
    %210 = arith.mulf %203, %209 : vector<2x16xf32>
    %211 = arith.addf %206, %210 : vector<2x16xf32>
    %212 = math.tanh %211 : vector<2x16xf32>
    %cst_47 = arith.constant 1.000000e+00 : f32
    %213 = vector.broadcast %cst_47 : f32 to vector<2x16xf32>
    %214 = arith.subf %213, %204 : vector<2x16xf32>
    %215 = arith.mulf %214, %212 : vector<2x16xf32>
    %216 = arith.mulf %204, %182 : vector<2x16xf32>
    %217 = arith.addf %215, %216 : vector<2x16xf32>
    %218 = arith.truncf %217 : vector<2x16xf32> to vector<2x16xbf16>
    %219 = arith.index_cast %c5_i32 : i32 to index
    %c0_48 = arith.constant 0 : index
    %c0_49 = arith.constant 0 : index
    %220 = vector.load %arg7[%219, %c0_48, %c0_49] : memref<8x2x16xbf16, #tpu.memory_space<vmem>>, vector<1x2x16xbf16>
    %221 = vector.shape_cast %220 : vector<1x2x16xbf16> to vector<2x16xbf16>
    %222 = vector.shape_cast %218 : vector<2x16xbf16> to vector<1x2x16xbf16>
    tpu.vector_store %arg7[%219, %c0_48, %c0_49], %222 {strides = array<i32>} : memref<8x2x16xbf16, #tpu.memory_space<vmem>>, vector<1x2x16xbf16>,
    %c6_i32 = arith.constant 6 : i32
    %223 = arith.index_cast %c6_i32 : i32 to index
    %c0_50 = arith.constant 0 : index
    %c0_51 = arith.constant 0 : index
    %224 = vector.load %arg2[%223, %c0_50, %c0_51] : memref<8x2x48xbf16, #tpu.memory_space<vmem>>, vector<1x2x48xbf16>
    %225 = vector.shape_cast %224 : vector<1x2x48xbf16> to vector<2x48xbf16>
    %226 = arith.extf %225 : vector<2x48xbf16> to vector<2x48xf32>
    %227 = arith.truncf %217 : vector<2x16xf32> to vector<2x16xbf16>
    %cst_52 = arith.constant dense<0.000000e+00> : vector<2x48xf32>
    %228 = tpu.matmul %227, %3, %cst_52 {dimension_numbers = #tpu.dot_dimension_numbers<[1], [0], [0], [1], [0, 0, 1, 1], [], []>} : vector<2x16xbf16>, vector<16x48xbf16>, vector<2x48xf32> -> vector<2x48xf32>
    %229 = vector.extract_strided_slice %226 {offsets = [0, 0], sizes = [2, 32], strides = [1, 1]} : vector<2x48xf32> to vector<2x32xf32>
    %230 = arith.addf %229, %9 : vector<2x32xf32>
    %231 = vector.extract_strided_slice %228 {offsets = [0, 0], sizes = [2, 32], strides = [1, 1]} : vector<2x48xf32> to vector<2x32xf32>
    %232 = arith.addf %230, %231 : vector<2x32xf32>
    %233 = arith.negf %232 : vector<2x32xf32>
    %234 = math.exp %233 : vector<2x32xf32>
    %cst_53 = arith.constant 1.000000e+00 : f32
    %235 = vector.broadcast %cst_53 : f32 to vector<2x32xf32>
    %236 = arith.addf %235, %234 : vector<2x32xf32>
    %237 = arith.divf %235, %236 : vector<2x32xf32>
    %238 = vector.extract_strided_slice %237 {offsets = [0, 0], sizes = [2, 16], strides = [1, 1]} : vector<2x32xf32> to vector<2x16xf32>
    %239 = vector.extract_strided_slice %237 {offsets = [0, 16], sizes = [2, 16], strides = [1, 1]} : vector<2x32xf32> to vector<2x16xf32>
    %240 = vector.extract_strided_slice %226 {offsets = [0, 32], sizes = [2, 16], strides = [1, 1]} : vector<2x48xf32> to vector<2x16xf32>
    %241 = arith.addf %240, %10 : vector<2x16xf32>
    %242 = vector.extract_strided_slice %228 {offsets = [0, 32], sizes = [2, 16], strides = [1, 1]} : vector<2x48xf32> to vector<2x16xf32>
    %243 = vector.broadcast %11 : vector<1x16xf32> to vector<2x16xf32>
    %244 = arith.addf %242, %243 : vector<2x16xf32>
    %245 = arith.mulf %238, %244 : vector<2x16xf32>
    %246 = arith.addf %241, %245 : vector<2x16xf32>
    %247 = math.tanh %246 : vector<2x16xf32>
    %cst_54 = arith.constant 1.000000e+00 : f32
    %248 = vector.broadcast %cst_54 : f32 to vector<2x16xf32>
    %249 = arith.subf %248, %239 : vector<2x16xf32>
    %250 = arith.mulf %249, %247 : vector<2x16xf32>
    %251 = arith.mulf %239, %217 : vector<2x16xf32>
    %252 = arith.addf %250, %251 : vector<2x16xf32>
    %253 = arith.truncf %252 : vector<2x16xf32> to vector<2x16xbf16>
    %254 = arith.index_cast %c6_i32 : i32 to index
    %c0_55 = arith.constant 0 : index
    %c0_56 = arith.constant 0 : index
    %255 = vector.load %arg7[%254, %c0_55, %c0_56] : memref<8x2x16xbf16, #tpu.memory_space<vmem>>, vector<1x2x16xbf16>
    %256 = vector.shape_cast %255 : vector<1x2x16xbf16> to vector<2x16xbf16>
    %257 = vector.shape_cast %253 : vector<2x16xbf16> to vector<1x2x16xbf16>
    tpu.vector_store %arg7[%254, %c0_55, %c0_56], %257 {strides = array<i32>} : memref<8x2x16xbf16, #tpu.memory_space<vmem>>, vector<1x2x16xbf16>,
    %c7_i32 = arith.constant 7 : i32
    %258 = arith.index_cast %c7_i32 : i32 to index
    %c0_57 = arith.constant 0 : index
    %c0_58 = arith.constant 0 : index
    %259 = vector.load %arg2[%258, %c0_57, %c0_58] : memref<8x2x48xbf16, #tpu.memory_space<vmem>>, vector<1x2x48xbf16>
    %260 = vector.shape_cast %259 : vector<1x2x48xbf16> to vector<2x48xbf16>
    %261 = arith.extf %260 : vector<2x48xbf16> to vector<2x48xf32>
    %262 = arith.truncf %252 : vector<2x16xf32> to vector<2x16xbf16>
    %cst_59 = arith.constant dense<0.000000e+00> : vector<2x48xf32>
    %263 = tpu.matmul %262, %3, %cst_59 {dimension_numbers = #tpu.dot_dimension_numbers<[1], [0], [0], [1], [0, 0, 1, 1], [], []>} : vector<2x16xbf16>, vector<16x48xbf16>, vector<2x48xf32> -> vector<2x48xf32>
    %264 = vector.extract_strided_slice %261 {offsets = [0, 0], sizes = [2, 32], strides = [1, 1]} : vector<2x48xf32> to vector<2x32xf32>
    %265 = arith.addf %264, %9 : vector<2x32xf32>
    %266 = vector.extract_strided_slice %263 {offsets = [0, 0], sizes = [2, 32], strides = [1, 1]} : vector<2x48xf32> to vector<2x32xf32>
    %267 = arith.addf %265, %266 : vector<2x32xf32>
    %268 = arith.negf %267 : vector<2x32xf32>
    %269 = math.exp %268 : vector<2x32xf32>
    %cst_60 = arith.constant 1.000000e+00 : f32
    %270 = vector.broadcast %cst_60 : f32 to vector<2x32xf32>
    %271 = arith.addf %270, %269 : vector<2x32xf32>
    %272 = arith.divf %270, %271 : vector<2x32xf32>
    %273 = vector.extract_strided_slice %272 {offsets = [0, 0], sizes = [2, 16], strides = [1, 1]} : vector<2x32xf32> to vector<2x16xf32>
    %274 = vector.extract_strided_slice %272 {offsets = [0, 16], sizes = [2, 16], strides = [1, 1]} : vector<2x32xf32> to vector<2x16xf32>
    %275 = vector.extract_strided_slice %261 {offsets = [0, 32], sizes = [2, 16], strides = [1, 1]} : vector<2x48xf32> to vector<2x16xf32>
    %276 = arith.addf %275, %10 : vector<2x16xf32>
    %277 = vector.extract_strided_slice %263 {offsets = [0, 32], sizes = [2, 16], strides = [1, 1]} : vector<2x48xf32> to vector<2x16xf32>
    %278 = vector.broadcast %11 : vector<1x16xf32> to vector<2x16xf32>
    %279 = arith.addf %277, %278 : vector<2x16xf32>
    %280 = arith.mulf %273, %279 : vector<2x16xf32>
    %281 = arith.addf %276, %280 : vector<2x16xf32>
    %282 = math.tanh %281 : vector<2x16xf32>
    %cst_61 = arith.constant 1.000000e+00 : f32
    %283 = vector.broadcast %cst_61 : f32 to vector<2x16xf32>
    %284 = arith.subf %283, %274 : vector<2x16xf32>
    %285 = arith.mulf %284, %282 : vector<2x16xf32>
    %286 = arith.mulf %274, %252 : vector<2x16xf32>
    %287 = arith.addf %285, %286 : vector<2x16xf32>
    %288 = arith.truncf %287 : vector<2x16xf32> to vector<2x16xbf16>
    %289 = arith.index_cast %c7_i32 : i32 to index
    %c0_62 = arith.constant 0 : index
    %c0_63 = arith.constant 0 : index
    %290 = vector.load %arg7[%289, %c0_62, %c0_63] : memref<8x2x16xbf16, #tpu.memory_space<vmem>>, vector<1x2x16xbf16>
    %291 = vector.shape_cast %290 : vector<1x2x16xbf16> to vector<2x16xbf16>
    %292 = vector.shape_cast %288 : vector<2x16xbf16> to vector<1x2x16xbf16>
    tpu.vector_store %arg7[%289, %c0_62, %c0_63], %292 {strides = array<i32>} : memref<8x2x16xbf16, #tpu.memory_space<vmem>>, vector<1x2x16xbf16>,
    %c8_i32 = arith.constant 8 : i32
    %c0_64 = arith.constant 0 : index
    %c0_65 = arith.constant 0 : index
    %293 = vector.load %arg9[%c0_64, %c0_65] : memref<2x16xf32, #tpu.memory_space<vmem>>, vector<2x16xf32>
    tpu.vector_store %arg9[%c0_64, %c0_65], %287 {strides = array<i32>} : memref<2x16xf32, #tpu.memory_space<vmem>>, vector<2x16xf32>,
    %c0_i32_66 = arith.constant 0 : i32
    %294 = arith.cmpi eq, %arg1, %c0_i32_66 : i32
    %295 = arith.extui %294 : i1 to i32
    %c0_i32_67 = arith.constant 0 : i32
    %296 = arith.cmpi ne, %295, %c0_i32_67 : i32
    scf.if %296 {
      %c0_68 = arith.constant 0 : index
      %c0_69 = arith.constant 0 : index
      %297 = vector.load %arg8[%c0_68, %c0_69] : memref<2x16xf32, #tpu.memory_space<vmem>>, vector<2x16xf32>
      tpu.vector_store %arg8[%c0_68, %c0_69], %287 {strides = array<i32>} : memref<2x16xf32, #tpu.memory_space<vmem>>, vector<2x16xf32>,
    } else {
    }
    return
  }
  func.func @transform_0(%arg0: i32, %arg1: i32) -> (i32, i32, i32) {
    %c0_i32 = arith.constant 0 : i32
    %c0_i32_0 = arith.constant 0 : i32
    return %arg1, %arg0, %c0_i32 : i32, i32, i32
  }
  func.func @transform_1(%arg0: i32, %arg1: i32) -> (i32, i32) {
    %c0_i32 = arith.constant 0 : i32
    %c0_i32_0 = arith.constant 0 : i32
    return %arg0, %c0_i32 : i32, i32
  }
  func.func @transform_2(%arg0: i32, %arg1: i32) -> (i32, i32) {
    %c0_i32 = arith.constant 0 : i32
    %c0_i32_0 = arith.constant 0 : i32
    %c0_i32_1 = arith.constant 0 : i32
    return %c0_i32, %c0_i32_0 : i32, i32
  }
  func.func @transform_3(%arg0: i32, %arg1: i32) -> (i32, i32) {
    %c0_i32 = arith.constant 0 : i32
    %c0_i32_0 = arith.constant 0 : i32
    %c0_i32_1 = arith.constant 0 : i32
    return %c0_i32, %c0_i32_0 : i32, i32
  }
  func.func @transform_4(%arg0: i32, %arg1: i32) -> (i32, i32) {
    %c0_i32 = arith.constant 0 : i32
    %c0_i32_0 = arith.constant 0 : i32
    return %arg0, %c0_i32 : i32, i32
  }
  func.func @transform_5(%arg0: i32, %arg1: i32) -> (i32, i32, i32) {
    %c0_i32 = arith.constant 0 : i32
    %c0_i32_0 = arith.constant 0 : i32
    return %arg1, %arg0, %c0_i32 : i32, i32, i32
  }
  func.func @transform_6(%arg0: i32, %arg1: i32) -> (i32, i32) {
    %c0_i32 = arith.constant 0 : i32
    %c0_i32_0 = arith.constant 0 : i32
    return %arg0, %c0_i32 : i32, i32
  }
}

</mosaic_0001>

<bundles_post_ra>
// kernel: tpu_custom_call.1
= control target key start
LH: loop header
LB: loop body
LE: loop exit
PB: predicated region body
PF: predicated region fallthrough
CT: control target
= control target key end

     0   :  { %6 = vsyncpa [#allocation3], 0  ;;  %s340_s0 = inlined_call_operand.hbm [shape: f32[8,128], index: 0, kind: input, shape index: {}]   ;;  %s341_s1 = inlined_call_operand.hbm [shape: f32[8,128], index: 1, kind: output, shape index: {}]  }
   0x1   :  { %7 = vsyncpa [#allocation4], 0  ;;  %s261_s6 = smov 0  }
   0x2 LB: > { %s144_s7 = sadd.s32 4294967295, %s247_s6   ;;  %p145_p0 = scmp.ge.s32.totalorder %s247_s6, 1  ;;  %s247_s6 = sphi %s261_s6, %s13_s6  }
   0x3   : > { %p60_p1 = scmp.lt.s32.totalorder %s247_s6, 3  ;;  %p275_p3 = scmp.eq.s32.totalorder %s144_s7, 0 }
   0x4   : > { %s249_s10 = smov [#allocation2]   ;;  %s179_s15 = scalar_lea.hbm %s340_s0, 128 }
   0x5   : > { %p269_p2 = pnand %p145_p0, %p60_p1  ;;  %s73_s11 = sshll.u32 %s249_s10, 4  ;;  %s74_s11 = int_to_ptr.vmem [resolvable:$true] %s73_s11 }
   0x6   : > { %s346_s9 = scalar_select %p275_p3, 1, 0 }
   0x7   : > { %s345_s8 = scalar_select %p269_p2, 1, 0 }
   0x8   : > { %p161_p4 = pneg %p269_p2  ;;  %p180_p6 = scmp.ne.s32.totalorder %s340_s0, %s179_s15 }
   0x9   : > { %p186_p10 = scmp.lt.u32.totalorder %s179_s15, %s340_s0 }
   0xa   : > { %p283_p5 = pnand %p275_p3, %p161_p4 }
   0xc   : > { %p181_p7 = pneg %p283_p5 }
   0xe   : > { %p182_p8 = pnand %p181_p7, %p180_p6 }
  0x10   : > { %p183_p9 = pneg %p182_p8 }
  0x12   : > { %p188_p11 = pnand %p186_p10, %p183_p9 }
  0x14   : > { %191 = shalt.err (!%p188_p11)
}
  0x15   : > { %s192_s20 = scalar_lea.vmem %s74_s11, 128  ;;  %p200_p1 = scmp.lt.s32.totalorder %s74_s11, %s74_s11 }
  0x16   : > { %p193_p12 = scmp.ne.s32.totalorder %s74_s11, %s192_s20  ;;  %p201_p4 = scmp.lt.s32.totalorder %s192_s20, %s192_s20 }
  0x18   : > { %p195_p13 = pnand %p193_p12, %p181_p7  ;;  %p202_p3 = por %p201_p4, %p200_p1 }
  0x1a   : > { %p196_p0 = pneg %p195_p13 }
  0x1c   : > { %p203_p2 = pnand %p202_p3, %p196_p0 }
  0x1e   : > { %206 = shalt.err (!%p203_p2)
}
  0x1f   : > { %164 = dma.hbm_to_vmem [thread:$0]  (!%p283_p5), %s340_s0, 128, %s74_s11, [#allocation3]  }
  0x20   : > { %p348_p6 = scmp.ne.s32.totalorder %s345_s8, 0 }
  0x21   : > { %p349_p8 = scmp.ne.s32.totalorder (!%p348_p6), %s346_s9, 0 }
  0x22   : > { %86 = sbr.rel (%p348_p6) target bundleno = 67 (0x43), region = 24 }
  0x29   : > { %238 = dma.done.wait (%p349_p8), [#allocation3], 128  }
  0x2a   : > { %240 = vsyncadd (%p349_p8), [#allocation3], 4294967168  ;;  %s250_s23 = smov [#allocation5]   ;;  %p311_p2 = scmp.eq.s32.totalorder %s144_s7, 1  ;;  %v96_v0 = vld [vmem:[#allocation2] sm:$0xff] }
  0x2b   : > { %s105_s24 = sshll.u32 %s250_s23, 4  ;;  %97 = vst [vmem:[#allocation5] sm:$0xff] %v96_v0  ;;  %s106_s24 = int_to_ptr.vmem [resolvable:$true] %s105_s24 }
  0x2c   : > { %s207_s26 = scalar_lea.vmem %s106_s24, 128  ;;  %p214_p9 = scmp.lt.s32.totalorder %s106_s24, %s106_s24 }
  0x2d   : > { %p208_p3 = scmp.ne.s32.totalorder %s106_s24, %s207_s26  ;;  %p215_p10 = scmp.lt.s32.totalorder %s207_s26, %s207_s26 }
  0x2f   : > { %p209_p5 = pnand %p208_p3, %p311_p2  ;;  %p216_p11 = por %p215_p10, %p214_p9 }
  0x31   : > { %p210_p7 = pneg %p209_p5 }
  0x33   : > { %p217_p12 = pnand %p216_p11, %p210_p7 }
  0x35   : > { %220 = shalt.err (!%p217_p12)
}
  0x36   : > { %s221_s29 = scalar_lea.hbm %s341_s1, 128 }
  0x37   : > { %p222_p13 = scmp.ne.s32.totalorder %s341_s1, %s221_s29  ;;  %p227_p4 = scmp.lt.u32.totalorder %s221_s29, %s341_s1 }
  0x39   : > { %p223_p0 = pnand %p222_p13, %p311_p2 }
  0x3b   : > { %p224_p1 = pneg %p223_p0 }
  0x3d   : > { %p229_p6 = pnand %p227_p4, %p224_p1 }
  0x3f   : > { %232 = shalt.err (!%p229_p6)
}
  0x40   : > { %158 = dma.vmem_to_hbm [thread:$0]  (%p311_p2), %s106_s24, 128, %s341_s1, [#allocation4]  }
  0x41   : > { %242 = dma.done.wait (%p311_p2), [#allocation4], 128  }
  0x42   : > { %244 = vsyncadd (%p311_p2), [#allocation4], 4294967168 }
  0x43 PF: > { %s13_s6 = sadd.s32 1, %s247_s6  }
  0x44   : > { %p10_p8 = scmp.ge.s32.totalorder %s13_s6, 4  }
  0x46   :  { %12 = sbr.rel (!%p10_p8) target bundleno = 2 (0x2), region = 53 }
  0x4d   :  { %118 = vsyncpa [#allocation3], 1 }
  0x4e   :  { %120 = vsyncpa [#allocation3 + $0x1], 1 }
  0x4f   :  { %121 = vsyncpa [#allocation4], 1 }
  0x50   :  { %123 = vsyncpa [#allocation4 + $0x1], 1 }

// kernel: encoder_decoder_forward.5
= control target key start
LH: loop header
LB: loop body
LE: loop exit
PB: predicated region body
PF: predicated region fallthrough
CT: control target
= control target key end

     0   :  { %vm34_vm0 = vcmask 1043456   ;;  %v112_v0 = vmov 0.0   ;;  %vm113_vm1 = vmmov 0   ;;  %vm30_vm2 = vcmask 64512   ;;  %s149_s1 = inlined_call_operand.vmem [shape: bf16[8,48], index: 1, kind: input, shape index: {}]   ;;  %s150_s0 = inlined_call_operand.vmem [shape: bf16[16,8], index: 0, kind: input, shape index: {}]   ;;  %s151_s2 = inlined_call_operand.vmem [shape: f32[1,48], index: 2, kind: input, shape index: {}]   ;;  %s152_s3 = inlined_call_operand.vmem [shape: bf16[16,48], index: 3, kind: output, shape index: {}]  }
   0x1   :  { %103 = vmatprep.subr.bf16.mxu0 %v112_v0  ;;  %v17_v1 = vld [vmem:[%s149_s1] sm:$0xf]  ;;  %105 = vmatprep.mubr.msk.bf16.mxu0 %vm113_vm1, %v112_v0  ;;  %vm87_vm3 = vcmask 388096  }
   0x2   :  { %v36_v2 = vsel %vm34_vm0, %v17_v1, 0  ;;  %v111_v3 = vld [vmem:[%s150_s0] sm:$0xff]  }
   0x3   :  { %104 = vmatpush3.bf16.msra.mxu0 %v36_v2  ;;  %v94_v4 = vld [vmem:[%s151_s2] ss:$0 sm:$0xff] }
   0x6   :  { %106 = vmatmul.mubr.msk.bf16.vlgmr.msra.gmra.mrb[0].mxu0 %vm30_vm2, %v111_v3 }
  0xd9   :  { %v72_v5 = vpop.f32.mrb[0].mxu0 }
  0xda   :  { %v73_v6 = vadd.f32 %v94_v4, %v72_v5  ;;  %v107_v7 = vpop.f32.mrb[1].mxu0 }
  0xdb   :  { %v75_v8 = vpop.f32.mrb[2].mxu0 }
  0xdc   :  { %v99_v9 = vpack.c.bf16 %v73_v6, %v73_v6  ;;  %v76_v10 = vadd.f32 %v94_v4, %v75_v8  ;;  %v108_v11 = vpop.f32.mrb[3].mxu0 }
  0xde   :  { %88 = vst.msk [vmem:[%s152_s3] sm:$0xf] %vm87_vm3, %v99_v9  ;;  %v100_v12 = vpack.c.bf16 %v76_v10, %v76_v10 }
  0xe0   :  { %89 = vst.msk [vmem:[%s152_s3 + $0x4] sm:$0xf] %vm87_vm3, %v100_v12 }

// kernel: encoder_decoder_forward.9
= control target key start
LH: loop header
LB: loop body
LE: loop exit
PB: predicated region body
PF: predicated region fallthrough
CT: control target
= control target key end

     0   :  { %v51_v1 = vlaneseq  ;;  %v513_v2 = vmov 0.0   ;;  %vm514_vm0 = vmmov 0   ;;  %v515_v3 = vmov 1966171168   ;;  %s597_s0 = inlined_call_operand.vmem [shape: bf16[8,2,16], index: 0, kind: input, shape index: {}]   ;;  %s598_s1 = inlined_call_operand.vmem [shape: bf16[16,16], index: 1, kind: input, shape index: {}]   ;;  %s599_s2 = inlined_call_operand.vmem [shape: f32[1,16], index: 2, kind: input, shape index: {}]   ;;  %s600_s3 = inlined_call_operand.hbm [shape: f32[2,8,16], index: 3, kind: output, shape index: {}]  }
   0x1   :  { %v488_v0 = vld [vmem:[%s598_s1] sm:$0xff]   ;;  %470 = vmatprep.subr.bf16.mxu0 %v513_v2  ;;  %476 = vmatprep.subr.bf16.mxu1 %v513_v2  ;;  %v49_v4 = vunpack.c.l.s4 %v515_v3  ;;  %vm162_vm1 = vcmask 1041409   ;;  %vm165_vm2 = vcmask 1042434   ;;  %vm168_vm3 = vcmask 1043459  }
   0x2   :  { %471 = vmatpush3.bf16.msra.mxu0 %v488_v0  ;;  %477 = vmatpush3.bf16.msra.mxu1 %v488_v0  ;;  %v52_v5 = vshrl.u32 %v51_v1, 7  ;;  %v447_v6 = vld.sshfl [vmem:[%s597_s0] sm:$0x1 pattern:$0x75316420]  ;;  %vm171_vm4 = vcmask 1044484  }
   0x3   :  { %472 = vmatprep.mubr.msk.bf16.mxu0 %vm514_vm0, %v513_v2  ;;  %478 = vmatprep.mubr.msk.bf16.mxu1 %vm514_vm0, %v513_v2  ;;  %v448_v7 = vld.sshfl [vmem:[%s597_s0 + $0x1] sm:$0x1 pattern:$0x75316420]  ;;  %v50_v11 = vunpack.c.0.s8 %v49_v4 }
   0x4   :  { %v449_v8 = vld.sshfl [vmem:[%s597_s0 + $0x2] sm:$0x1 pattern:$0x75316420] }
   0x5   :  { %v450_v9 = vld.sshfl [vmem:[%s597_s0 + $0x3] sm:$0x1 pattern:$0x75316420]  ;;  %v53_v14 = vsub.s32 %v50_v11, %v52_v5 }
   0x6   :  { %v451_v10 = vld.sshfl [vmem:[%s597_s0 + $0x4] sm:$0x1 pattern:$0x75316420] }
   0x7   :  { %v452_v12 = vld.sshfl [vmem:[%s597_s0 + $0x5] sm:$0x1 pattern:$0x75316420] }
   0x8   :  { %v453_v13 = vld.sshfl [vmem:[%s597_s0 + $0x6] sm:$0x1 pattern:$0x75316420] }
   0x9   :  { %v454_v15 = vld.sshfl [vmem:[%s597_s0 + $0x7] sm:$0x1 pattern:$0x75316420] }
   0xa   :  { %8 = vsyncpa [#allocation3], 0  ;;  %v54_v16 = vrot.slane %v447_v6, %v53_v14  ;;  %v68_v17 = vrot.slane %v448_v7, %v53_v14  ;;  %v82_v18 = vrot.slane %v449_v8, %v53_v14  ;;  %v96_v19 = vrot.slane %v450_v9, %v53_v14  ;;  %v446_v62 = vld [vmem:[%s599_s2] ss:$0 sm:$0xff]  ;;  %s516_s30 = smov [#allocation2]  }
   0xb   :  { %v110_v20 = vrot.slane %v451_v10, %v53_v14  ;;  %v124_v21 = vrot.slane %v452_v12, %v53_v14  ;;  %v138_v22 = vrot.slane %v453_v13, %v53_v14  ;;  %v152_v23 = vrot.slane %v454_v15, %v53_v14  ;;  %s435_s4 = sshll.u32 %s516_s30, 4  ;;  %s436_s4 = int_to_ptr.vmem [resolvable:$true] %s435_s4 }
   0xc   :  { %v153_v24 = vunpack.c.l.b16 %v54_v16  ;;  %v154_v25 = vunpack.c.l.b16 %v68_v17  ;;  %v155_v26 = vunpack.c.l.b16 %v82_v18  ;;  %v156_v27 = vunpack.c.l.b16 %v96_v19  ;;  %s489_s5 = scalar_lea.vmem %s436_s4, 256  ;;  %p494_p1 = scmp.lt.s32.totalorder %s436_s4, %s436_s4 }
   0xd   :  { %v157_v28 = vunpack.c.l.b16 %v110_v20  ;;  %v158_v29 = vunpack.c.l.b16 %v124_v21  ;;  %v159_v30 = vunpack.c.l.b16 %v138_v22  ;;  %v160_v31 = vunpack.c.l.b16 %v152_v23  ;;  %p490_p0 = scmp.ne.s32.totalorder %s436_s4, %s489_s5  ;;  %p495_p2 = scmp.lt.s32.totalorder %s489_s5, %s489_s5 }
   0xe   :  { %v161_v32 = vrot.slane %v154_v25, 7  ;;  %v164_v33 = vrot.slane %v155_v26, 6  ;;  %v167_v34 = vrot.slane %v156_v27, 5  ;;  %v370_v35 = vrot.slane %v153_v24, 1 }
   0xf   :  { %v170_v36 = vrot.slane %v157_v28, 4  ;;  %v173_v37 = vrot.slane %v158_v29, 3  ;;  %vm174_vm5 = vcmask 1045509   ;;  %vm177_vm6 = vcmask 1046534   ;;  %p496_p3 = por %p495_p2, %p494_p1 }
  0x10   :  { %v163_v38 = vsel %vm162_vm1, %v161_v32, %v153_v24  ;;  %v371_v39 = vsel %vm162_vm1, %v154_v25, %v370_v35  ;;  %v372_v40 = vrot.slane %v155_v26, 7  ;;  %v374_v41 = vrot.slane %v156_v27, 6 }
  0x11   :  { %v166_v42 = vsel %vm165_vm2, %v164_v33, %v163_v38  ;;  %v176_v43 = vrot.slane %v159_v30, 2  ;;  %v376_v44 = vrot.slane %v157_v28, 5  ;;  %v378_v45 = vrot.slane %v158_v29, 4  ;;  %p497_p4 = pnand %p496_p3, %p490_p0 }
  0x12   :  { %v169_v46 = vsel %vm168_vm3, %v167_v34, %v166_v42  ;;  %v179_v47 = vrot.slane %v160_v31, 1  ;;  %v373_v48 = vsel %vm165_vm2, %v372_v40, %v371_v39  ;;  %v380_v49 = vrot.slane %v159_v30, 3 }
  0x13   :  { %v172_v50 = vsel %vm171_vm4, %v170_v36, %v169_v46  ;;  %vm180_vm7 = vcmask 1047559   ;;  %v375_v51 = vsel %vm168_vm3, %v374_v41, %v373_v48  ;;  %v382_v52 = vrot.slane %v160_v31, 2 }
  0x14   :  { %v175_v53 = vsel %vm174_vm5, %v173_v37, %v172_v50  ;;  %v377_v54 = vsel %vm171_vm4, %v376_v44, %v375_v51  ;;  %vm189_vm8 = vcmask 130048  }
  0x15   :  { %v178_v55 = vsel %vm177_vm6, %v176_v43, %v175_v53  ;;  %v379_v56 = vsel %vm174_vm5, %v378_v45, %v377_v54 }
  0x16   :  { %v181_v57 = vsel %vm180_vm7, %v179_v47, %v178_v55  ;;  %v381_v58 = vsel %vm177_vm6, %v380_v49, %v379_v56 }
  0x17   :  { %v182_v59 = vpack.c.b16 %v181_v57, %v181_v57  ;;  %v383_v60 = vsel %vm180_vm7, %v382_v52, %v381_v58 }
  0x18   :  { %v384_v61 = vpack.c.b16 %v383_v60, %v383_v60 }
  0x19   :  { %473 = vmatmul.mubr.msk.bf16.vlgmr.msra.gmra.mrb[0].mxu0 %vm189_vm8, %v182_v59 }
  0x1a   :  { %479 = vmatmul.mubr.msk.bf16.vlgmr.msra.gmra.mrb[0].mxu1 %vm189_vm8, %v384_v61 }
  0xec   :  { %v227_v63 = vpop.f32.mrb[0].mxu0 }
  0xed   :  { %v228_v0 = vadd.f32 %v446_v62, %v227_v63  ;;  %v422_v1 = vpop.f32.mrb[0].mxu1  ;;  %v474_v2 = vpop.f32.mrb[1].mxu0 }
  0xee   :  { %v423_v3 = vadd.f32 %v446_v62, %v422_v1  ;;  %v480_v4 = vpop.f32.mrb[1].mxu1  ;;  %v230_v5 = vpop.f32.mrb[2].mxu0 }
  0xef   :  { %233 = vst.msk [vmem:[#allocation2] sm:$0xff] %vm189_vm8, %v228_v0  ;;  %v425_v6 = vpop.f32.mrb[2].mxu1  ;;  %v475_v7 = vpop.f32.mrb[3].mxu0 }
  0xf0   :  { %429 = vst.msk [vmem:[#allocation2 + $0x8] sm:$0xff] %vm189_vm8, %v423_v3  ;;  %v481_v8 = vpop.f32.mrb[3].mxu1 }
  0xf1   :  { %500 = shalt.err (!%p497_p4)
}
  0xf2   :  { %s501_s7 = scalar_lea.hbm %s600_s3, 256 }
  0xf3   :  { %p502_p5 = scmp.ne.s32.totalorder %s600_s3, %s501_s7  ;;  %p505_p6 = scmp.lt.u32.totalorder %s501_s7, %s600_s3 }
  0xf5   :  { %p507_p7 = pnand %p505_p6, %p502_p5 }
  0xf7   :  { %510 = shalt.err (!%p507_p7)
}
  0xf8   :  { %s517_s12 = smov 128   ;;  %s518_s13 = smov 8  }
  0xf9   :  { %441 = dma.vmem_to_hbm [thread:$0]  %s436_s4, 256, %s600_s3, [#allocation3], %s517_s12, %s517_s12, %s518_s13  }
  0xfa   :  { %511 = dma.done.wait [#allocation3], 256  }
  0xfb   :  { %512 = vsyncadd [#allocation3], 4294967040 }
  0xfc   :  { %445 = vsyncpa [#allocation3], 1 }

// kernel: encoder_decoder_forward.6
= control target key start
LH: loop header
LB: loop body
LE: loop exit
PB: predicated region body
PF: predicated region fallthrough
CT: control target
= control target key end

     0   :  { %vm26_vm0 = vcmask 123904   ;;  %v908_v0 = vmov 0.0   ;;  %vm909_vm1 = vmmov 0   ;;  %vm49_vm2 = vcmask 130048   ;;  %s911_s22 = smov 96   ;;  %s914_s27 = smov 16   ;;  %s1105_s2 = inlined_call_operand.vmem [shape: bf16[16,48], index: 2, kind: input, shape index: {}]   ;;  %s1106_s4 = inlined_call_operand.vmem [shape: f32[2,16], index: 4, kind: input, shape index: {}]   ;;  %s1107_s3 = inlined_call_operand.vmem [shape: f32[1,48], index: 3, kind: input, shape index: {}]   ;;  %s1108_s0 = inlined_call_operand.vmem [shape: bf16[8,2,48], index: 0, kind: input, shape index: {}]   ;;  %s1109_s1 = inlined_call_operand.vmem [shape: f32[2,48], index: 1, kind: input, shape index: {}]   ;;  %s1110_s5 = inlined_call_operand.vmem [shape: f32[2,16], index: 5, kind: output, shape index: {}]  }
   0x1   :  { %804 = vmatprep.subr.bf16.mxu0 %v908_v0  ;;  %v949_v1 = vld [vmem:[%s1105_s2] sm:$0xff]   ;;  %806 = vmatprep.mubr.msk.bf16.mxu0 %vm909_vm1, %v908_v0  ;;  %v910_v5 = vmov 1983009808   ;;  %v107_v7 = vlaneseq }
   0x2   :  { %v25_v2 = vld [vmem:[%s1106_s4] sm:$0x3]  ;;  %810 = vmatprep.subr.bf16.mxu1 %v908_v0  ;;  %812 = vmatprep.mubr.msk.bf16.mxu1 %vm909_vm1, %v908_v0  ;;  %v105_v6 = vunpack.c.l.s4 %v910_v5 }
   0x3   :  { %805 = vmatpush3.bf16.msra.mxu0 %v949_v1  ;;  %27 = vst.msk [vmem:[#allocation2] sm:$0x3] %vm26_vm0, %v25_v2  ;;  %811 = vmatpush3.bf16.msra.mxu1 %v949_v1  ;;  %v108_v9 = vshrl.u32 %v107_v7, 7  ;;  %v974_v11 = vld [vmem:[%s1107_s3] ss:$0 sm:$0xff]  ;;  %s913_s3 = smov 112  }
   0x4   :  { %816 = vmatprep.subr.bf16.mxu0 %v908_v0  ;;  %822 = vmatprep.subr.bf16.mxu1 %v908_v0  ;;  %v106_v8 = vunpack.c.0.s8 %v105_v6  ;;  %v982_v18 = vld [vmem:[%s1109_s1] sm:$0x3]  ;;  %s912_s1 = smov 32  }
   0x5   :  { %v40_v19 = vld [vmem:[%s1108_s0] sm:$0x1]  ;;  %v989_v20 = vadd.f32 %v974_v11, %v982_v18  ;;  %v767_v49 = vld [vmem:[%s1108_s0 + $0x1] sm:$0x1] }
   0x6   :  { %v969_v10 = vsub.s32 %v106_v8, %v108_v9  ;;  %v41_v21 = vunpack.c.l.bf16 %v40_v19  ;;  %v142_v50 = vunpack.c.l.bf16 %v767_v49 }
   0x8   :  { %v93_v22 = vadd.f32 %v41_v21, %v989_v20  ;;  %v101_v30 = vadd.f32 %v41_v21, %v982_v18  ;;  %v190_v51 = vadd.f32 %v142_v50, %v989_v20  ;;  %v198_v59 = vadd.f32 %v142_v50, %v982_v18 }
   0xa   :  { %v39_v3 = vld [vmem:[#allocation2] sm:$0x3] }
   0xb   :  { %v42_v4 = vpack.c.bf16 %v39_v3, %v39_v3  ;;  %v134_v34 = vrot.slane %v39_v3, %v969_v10 }
   0xd   :  { %807 = vmatmul.mubr.msk.bf16.vlgmr.msra.gmra.mrb[0].mxu0 %vm49_vm2, %v42_v4 }
   0xe   :  { %817 = vmatpush3.bf16.msra.mxu0 %v949_v1  ;;  %818 = vmatprep.mubr.msk.bf16.mxu0 %vm909_vm1, %v908_v0 }
   0xf   :  { %828 = vmatprep.subr.bf16.mxu0 %v908_v0 }
  0xe0   :  { %v87_v12 = vpop.f32.mrb[0].mxu0 }
  0xe1   :  { %v102_v13 = vadd.f32 %v974_v11, %v87_v12  ;;  %v808_v14 = vpop.f32.mrb[1].mxu0  ;;  %v94_v23 = vadd.f32 %v93_v22, %v87_v12 }
  0xe2   :  { %v90_v15 = vpop.f32.mrb[2].mxu0 }
  0xe3   :  { %v809_v16 = vpop.f32.mrb[3].mxu0  ;;  %v110_v17 = vrot.slane %v102_v13, %v969_v10  ;;  %v766_v24 = vmul.f32 -1.442695, %v94_v23 }
  0xe4   :  { %v770_v16 = vld [vmem:[%s1108_s0 + $0x2] sm:$0x1] }
  0xe5   :  { %111 = vrot.lane.b32.xlu0 %v110_v17, %s911_s22  ;;  %860 = vpow2.f32 %v766_v24  ;;  %v228_v17 = vunpack.c.l.bf16 %v770_v16 }
  0xe7   :  { %v276_v19 = vadd.f32 %v228_v17, %v989_v20 }
  0xef   :  { %v861_v25 = vpop.eup %860 }
  0xf0   :  { %v98_v26 = vadd.f32 1.0, %v861_v25 }
  0xf2   :  { %862 = vrcp.f32 %v98_v26 }
  0xfc   :  { %v863_v27 = vpop.eup %862 }
  0xfd   :  { %v121_v36 = vsub.f32 1.0, %v863_v27 }
 0x157   :  { %v112_v28 = vpop.permute.xlu0 %111 }
 0x158   :  { %v114_v29 = vmul.f32 %v863_v27, %v112_v28  ;;  %v284_v28 = vadd.f32 %v228_v17, %v982_v18 }
 0x15a   :  { %116 = vrot.lane.b32.xlu0 %v114_v29, %s912_s1 }
 0x1cc   :  { %v117_v31 = vpop.permute.xlu0 %116 }
 0x1cd   :  { %v119_v32 = vadd.f32 %v117_v31, %v101_v30 }
 0x1cf   :  { %864 = vtanh.f32 %v119_v32 }
 0x1d9   :  { %v865_v33 = vpop.eup %864 }
 0x1da   :  { %123 = vrot.lane.b32.xlu1 %v865_v33, %s913_s3 }
 0x1de   :  { %135 = vrot.lane.b32.xlu1 %v134_v34, %s914_s27 }
 0x24c   :  { %v124_v35 = vpop.permute.xlu1 %123 }
 0x24d   :  { %v126_v38 = vmul.f32 %v124_v35, %v121_v36 }
 0x250   :  { %v136_v37 = vpop.permute.xlu1 %135 }
 0x251   :  { %v138_v39 = vmul.f32 %v863_v27, %v136_v37 }
 0x253   :  { %v139_v40 = vadd.f32 %v138_v39, %v126_v38 }
 0x255   :  { %v143_v41 = vpack.c.bf16 %v139_v40, %v139_v40 }
 0x257   :  { %145 = vrot.lane.b32.xlu0 %v143_v41, %s913_s3 }
 0x2c9   :  { %v146_v42 = vpop.permute.xlu0 %145 }
 0x2ca   :  { %813 = vmatmul.mubr.msk.bf16.vlgmr.msra.gmra.mrb[0].mxu1 %vm49_vm2, %v146_v42 }
 0x2cb   :  { %823 = vmatpush3.bf16.msra.mxu1 %v949_v1  ;;  %824 = vmatprep.mubr.msk.bf16.mxu1 %vm909_vm1, %v908_v0 }
 0x2cc   :  { %834 = vmatprep.subr.bf16.mxu1 %v908_v0 }
 0x39d   :  { %v184_v43 = vpop.f32.mrb[0].mxu1 }
 0x39e   :  { %v199_v44 = vadd.f32 %v974_v11, %v184_v43  ;;  %v814_v45 = vpop.f32.mrb[1].mxu1  ;;  %v191_v52 = vadd.f32 %v190_v51, %v184_v43 }
 0x39f   :  { %v187_v46 = vpop.f32.mrb[2].mxu1  ;;  %v773_v45 = vld [vmem:[%s1108_s0 + $0x3] sm:$0x1] }
 0x3a0   :  { %v207_v47 = vrot.slane %v199_v44, %v969_v10  ;;  %v815_v48 = vpop.f32.mrb[3].mxu1  ;;  %v769_v53 = vmul.f32 -1.442695, %v191_v52  ;;  %v314_v46 = vunpack.c.l.bf16 %v773_v45 }
 0x3a2   :  { %208 = vrot.lane.b32.xlu1 %v207_v47, %s911_s22  ;;  %866 = vpow2.f32 %v769_v53  ;;  %v362_v47 = vadd.f32 %v314_v46, %v989_v20 }
 0x3ac   :  { %v867_v54 = vpop.eup %866 }
 0x3ad   :  { %v195_v55 = vadd.f32 1.0, %v867_v54 }
 0x3af   :  { %868 = vrcp.f32 %v195_v55  ;;  %v370_v55 = vadd.f32 %v314_v46, %v982_v18 }
 0x3b9   :  { %v869_v56 = vpop.eup %868 }
 0x3ba   :  { %v218_v63 = vsub.f32 1.0, %v869_v56  ;;  %v224_v3 = vmul.f32 %v869_v56, %v139_v40 }
 0x414   :  { %v209_v57 = vpop.permute.xlu1 %208 }
 0x415   :  { %v211_v58 = vmul.f32 %v869_v56, %v209_v57 }
 0x417   :  { %213 = vrot.lane.b32.xlu0 %v211_v58, %s912_s1 }
 0x489   :  { %v214_v60 = vpop.permute.xlu0 %213 }
 0x48a   :  { %v216_v61 = vadd.f32 %v214_v60, %v198_v59 }
 0x48c   :  { %870 = vtanh.f32 %v216_v61 }
 0x496   :  { %v871_v62 = vpop.eup %870 }
 0x497   :  { %220 = vrot.lane.b32.xlu1 %v871_v62, %s913_s3 }
 0x509   :  { %v221_v2 = vpop.permute.xlu1 %220 }
 0x50a   :  { %v223_v4 = vmul.f32 %v221_v2, %v218_v63 }
 0x50c   :  { %v225_v5 = vadd.f32 %v224_v3, %v223_v4 }
 0x50e   :  { %v229_v6 = vpack.c.bf16 %v225_v5, %v225_v5 }
 0x510   :  { %231 = vrot.lane.b32.xlu0 %v229_v6, %s913_s3 }
 0x582   :  { %v232_v7 = vpop.permute.xlu0 %231 }
 0x583   :  { %819 = vmatmul.mubr.msk.bf16.vlgmr.msra.gmra.mrb[4].mxu0 %vm49_vm2, %v232_v7 }
 0x584   :  { %829 = vmatpush3.bf16.msra.mxu0 %v949_v1  ;;  %830 = vmatprep.mubr.msk.bf16.mxu0 %vm909_vm1, %v908_v0 }
 0x585   :  { %840 = vmatprep.subr.bf16.mxu0 %v908_v0 }
 0x656   :  { %v270_v8 = vpop.f32.mrb[4].mxu0 }
 0x657   :  { %v285_v9 = vadd.f32 %v974_v11, %v270_v8  ;;  %v820_v12 = vpop.f32.mrb[5].mxu0  ;;  %v277_v21 = vadd.f32 %v276_v19, %v270_v8 }
 0x658   :  { %v273_v13 = vpop.f32.mrb[6].mxu0  ;;  %v776_v12 = vld [vmem:[%s1108_s0 + $0x4] sm:$0x1] }
 0x659   :  { %v293_v14 = vrot.slane %v285_v9, %v969_v10  ;;  %v821_v15 = vpop.f32.mrb[7].mxu0  ;;  %v772_v22 = vmul.f32 -1.442695, %v277_v21  ;;  %v400_v13 = vunpack.c.l.bf16 %v776_v12 }
 0x65b   :  { %294 = vrot.lane.b32.xlu1 %v293_v14, %s911_s22  ;;  %872 = vpow2.f32 %v772_v22  ;;  %v448_v14 = vadd.f32 %v400_v13, %v989_v20 }
 0x665   :  { %v873_v23 = vpop.eup %872 }
 0x666   :  { %v281_v24 = vadd.f32 1.0, %v873_v23 }
 0x668   :  { %874 = vrcp.f32 %v281_v24  ;;  %v456_v24 = vadd.f32 %v400_v13, %v982_v18 }
 0x672   :  { %v875_v25 = vpop.eup %874 }
 0x673   :  { %v304_v32 = vsub.f32 1.0, %v875_v25  ;;  %v310_v34 = vmul.f32 %v875_v25, %v225_v5 }
 0x6cd   :  { %v295_v26 = vpop.permute.xlu1 %294 }
 0x6ce   :  { %v297_v27 = vmul.f32 %v875_v25, %v295_v26 }
 0x6d0   :  { %299 = vrot.lane.b32.xlu0 %v297_v27, %s912_s1 }
 0x742   :  { %v300_v29 = vpop.permute.xlu0 %299 }
 0x743   :  { %v302_v30 = vadd.f32 %v300_v29, %v284_v28 }
 0x745   :  { %876 = vtanh.f32 %v302_v30 }
 0x74f   :  { %v877_v31 = vpop.eup %876 }
 0x750   :  { %306 = vrot.lane.b32.xlu1 %v877_v31, %s913_s3 }
 0x7c2   :  { %v307_v33 = vpop.permute.xlu1 %306 }
 0x7c3   :  { %v309_v35 = vmul.f32 %v307_v33, %v304_v32 }
 0x7c5   :  { %v311_v36 = vadd.f32 %v310_v34, %v309_v35 }
 0x7c7   :  { %v315_v37 = vpack.c.bf16 %v311_v36, %v311_v36 }
 0x7c9   :  { %317 = vrot.lane.b32.xlu0 %v315_v37, %s913_s3 }
 0x83b   :  { %v318_v38 = vpop.permute.xlu0 %317 }
 0x83c   :  { %825 = vmatmul.mubr.msk.bf16.vlgmr.msra.gmra.mrb[4].mxu1 %vm49_vm2, %v318_v38 }
 0x83d   :  { %835 = vmatpush3.bf16.msra.mxu1 %v949_v1  ;;  %836 = vmatprep.mubr.msk.bf16.mxu1 %vm909_vm1, %v908_v0 }
 0x83e   :  { %846 = vmatprep.subr.bf16.mxu1 %v908_v0 }
 0x90f   :  { %v356_v39 = vpop.f32.mrb[4].mxu1 }
 0x910   :  { %v371_v40 = vadd.f32 %v974_v11, %v356_v39  ;;  %v826_v41 = vpop.f32.mrb[5].mxu1  ;;  %v363_v48 = vadd.f32 %v362_v47, %v356_v39 }
 0x911   :  { %v359_v42 = vpop.f32.mrb[6].mxu1  ;;  %v779_v41 = vld [vmem:[%s1108_s0 + $0x5] sm:$0x1] }
 0x912   :  { %v379_v43 = vrot.slane %v371_v40, %v969_v10  ;;  %v827_v44 = vpop.f32.mrb[7].mxu1  ;;  %v775_v49 = vmul.f32 -1.442695, %v363_v48  ;;  %v486_v42 = vunpack.c.l.bf16 %v779_v41 }
 0x914   :  { %380 = vrot.lane.b32.xlu1 %v379_v43, %s911_s22  ;;  %878 = vpow2.f32 %v775_v49  ;;  %v542_v49 = vadd.f32 %v486_v42, %v982_v18 }
 0x91e   :  { %v879_v50 = vpop.eup %878 }
 0x91f   :  { %v367_v51 = vadd.f32 1.0, %v879_v50 }
 0x921   :  { %880 = vrcp.f32 %v367_v51 }
 0x92b   :  { %v881_v52 = vpop.eup %880 }
 0x92c   :  { %v390_v59 = vsub.f32 1.0, %v881_v52  ;;  %v396_v61 = vmul.f32 %v881_v52, %v311_v36 }
 0x986   :  { %v381_v53 = vpop.permute.xlu1 %380 }
 0x987   :  { %v383_v54 = vmul.f32 %v881_v52, %v381_v53 }
 0x989   :  { %385 = vrot.lane.b32.xlu0 %v383_v54, %s912_s1 }
 0x9fb   :  { %v386_v56 = vpop.permute.xlu0 %385 }
 0x9fc   :  { %v388_v57 = vadd.f32 %v386_v56, %v370_v55 }
 0x9fe   :  { %882 = vtanh.f32 %v388_v57 }
 0xa08   :  { %v883_v58 = vpop.eup %882 }
 0xa09   :  { %392 = vrot.lane.b32.xlu1 %v883_v58, %s913_s3 }
 0xa7b   :  { %v393_v60 = vpop.permute.xlu1 %392 }
 0xa7c   :  { %v395_v62 = vmul.f32 %v393_v60, %v390_v59 }
 0xa7e   :  { %v397_v63 = vadd.f32 %v396_v61, %v395_v62 }
 0xa80   :  { %v401_v2 = vpack.c.bf16 %v397_v63, %v397_v63 }
 0xa82   :  { %403 = vrot.lane.b32.xlu0 %v401_v2, %s913_s3 }
 0xaf4   :  { %v404_v3 = vpop.permute.xlu0 %403 }
 0xaf5   :  { %831 = vmatmul.mubr.msk.bf16.vlgmr.msra.gmra.mrb[8].mxu0 %vm49_vm2, %v404_v3 }
 0xaf6   :  { %841 = vmatpush3.bf16.msra.mxu0 %v949_v1  ;;  %842 = vmatprep.mubr.msk.bf16.mxu0 %vm909_vm1, %v908_v0 }
 0xbc8   :  { %v442_v4 = vpop.f32.mrb[8].mxu0 }
 0xbc9   :  { %v457_v5 = vadd.f32 %v974_v11, %v442_v4  ;;  %v832_v6 = vpop.f32.mrb[9].mxu0  ;;  %v449_v15 = vadd.f32 %v448_v14, %v442_v4  ;;  %v782_v4 = vld [vmem:[%s1108_s0 + $0x6] sm:$0x1] }
 0xbca   :  { %v445_v7 = vpop.f32.mrb[10].mxu0 }
 0xbcb   :  { %v465_v8 = vrot.slane %v457_v5, %v969_v10  ;;  %v833_v9 = vpop.f32.mrb[11].mxu0  ;;  %v778_v16 = vmul.f32 -1.442695, %v449_v15  ;;  %v572_v5 = vunpack.c.l.bf16 %v782_v4 }
 0xbcd   :  { %466 = vrot.lane.b32.xlu1 %v465_v8, %s911_s22  ;;  %884 = vpow2.f32 %v778_v16  ;;  %v620_v6 = vadd.f32 %v572_v5, %v989_v20  ;;  %v628_v16 = vadd.f32 %v572_v5, %v982_v18 }
 0xbd7   :  { %v885_v17 = vpop.eup %884 }
 0xbd8   :  { %v453_v19 = vadd.f32 1.0, %v885_v17 }
 0xbda   :  { %886 = vrcp.f32 %v453_v19 }
 0xbe4   :  { %v887_v21 = vpop.eup %886 }
 0xbe5   :  { %v476_v28 = vsub.f32 1.0, %v887_v21  ;;  %v482_v30 = vmul.f32 %v887_v21, %v397_v63 }
 0xc3f   :  { %v467_v22 = vpop.permute.xlu1 %466 }
 0xc40   :  { %v469_v23 = vmul.f32 %v887_v21, %v467_v22 }
 0xc42   :  { %471 = vrot.lane.b32.xlu0 %v469_v23, %s912_s1 }
 0xcb4   :  { %v472_v25 = vpop.permute.xlu0 %471 }
 0xcb5   :  { %v474_v26 = vadd.f32 %v472_v25, %v456_v24 }
 0xcb7   :  { %888 = vtanh.f32 %v474_v26 }
 0xcc1   :  { %v889_v27 = vpop.eup %888 }
 0xcc2   :  { %478 = vrot.lane.b32.xlu1 %v889_v27, %s913_s3 }
 0xd34   :  { %v479_v29 = vpop.permute.xlu1 %478 }
 0xd35   :  { %v481_v31 = vmul.f32 %v479_v29, %v476_v28 }
 0xd37   :  { %v483_v32 = vadd.f32 %v482_v30, %v481_v31 }
 0xd39   :  { %v487_v33 = vpack.c.bf16 %v483_v32, %v483_v32 }
 0xd3b   :  { %489 = vrot.lane.b32.xlu0 %v487_v33, %s913_s3 }
 0xdad   :  { %v490_v34 = vpop.permute.xlu0 %489 }
 0xdae   :  { %837 = vmatmul.mubr.msk.bf16.vlgmr.msra.gmra.mrb[8].mxu1 %vm49_vm2, %v490_v34 }
 0xdaf   :  { %847 = vmatpush3.bf16.msra.mxu1 %v949_v1  ;;  %848 = vmatprep.mubr.msk.bf16.mxu1 %vm909_vm1, %v908_v0  ;;  %v534_v1 = vadd.f32 %v486_v42, %v989_v20 }
 0xe81   :  { %v528_v35 = vpop.f32.mrb[8].mxu1 }
 0xe82   :  { %v543_v36 = vadd.f32 %v974_v11, %v528_v35  ;;  %v838_v37 = vpop.f32.mrb[9].mxu1  ;;  %v535_v43 = vadd.f32 %v534_v1, %v528_v35  ;;  %v785_v35 = vld [vmem:[%s1108_s0 + $0x7] sm:$0x1] }
 0xe83   :  { %v531_v38 = vpop.f32.mrb[10].mxu1 }
 0xe84   :  { %v551_v39 = vrot.slane %v543_v36, %v969_v10  ;;  %v839_v40 = vpop.f32.mrb[11].mxu1  ;;  %v781_v44 = vmul.f32 -1.442695, %v535_v43  ;;  %v658_v36 = vunpack.c.l.bf16 %v785_v35 }
 0xe86   :  { %552 = vrot.lane.b32.xlu1 %v551_v39, %s911_s22  ;;  %890 = vpow2.f32 %v781_v44  ;;  %v706_v37 = vadd.f32 %v658_v36, %v989_v20  ;;  %v714_v43 = vadd.f32 %v658_v36, %v982_v18 }
 0xe90   :  { %v891_v0 = vpop.eup %890 }
 0xe91   :  { %v539_v45 = vadd.f32 1.0, %v891_v0 }
 0xe93   :  { %892 = vrcp.f32 %v539_v45 }
 0xe9d   :  { %v893_v46 = vpop.eup %892 }
 0xe9e   :  { %v562_v53 = vsub.f32 1.0, %v893_v46  ;;  %v568_v55 = vmul.f32 %v893_v46, %v483_v32 }
 0xef8   :  { %v553_v47 = vpop.permute.xlu1 %552 }
 0xef9   :  { %v555_v48 = vmul.f32 %v893_v46, %v553_v47 }
 0xefb   :  { %557 = vrot.lane.b32.xlu0 %v555_v48, %s912_s1 }
 0xf6d   :  { %v558_v50 = vpop.permute.xlu0 %557 }
 0xf6e   :  { %v560_v51 = vadd.f32 %v558_v50, %v542_v49 }
 0xf70   :  { %894 = vtanh.f32 %v560_v51 }
 0xf7a   :  { %v895_v52 = vpop.eup %894 }
 0xf7b   :  { %564 = vrot.lane.b32.xlu1 %v895_v52, %s913_s3 }
 0xfed   :  { %v565_v54 = vpop.permute.xlu1 %564 }
 0xfee   :  { %v567_v56 = vmul.f32 %v565_v54, %v562_v53 }
 0xff0   :  { %v569_v57 = vadd.f32 %v568_v55, %v567_v56 }
 0xff2   :  { %v573_v58 = vpack.c.bf16 %v569_v57, %v569_v57 }
 0xff4   :  { %575 = vrot.lane.b32.xlu0 %v573_v58, %s913_s3 }
0x1066   :  { %v576_v59 = vpop.permute.xlu0 %575 }
0x1067   :  { %843 = vmatmul.mubr.msk.bf16.vlgmr.msra.gmra.mrb[12].mxu0 %vm49_vm2, %v576_v59 }
0x113a   :  { %v614_v60 = vpop.f32.mrb[12].mxu0 }
0x113b   :  { %v629_v61 = vadd.f32 %v974_v11, %v614_v60  ;;  %v844_v62 = vpop.f32.mrb[13].mxu0  ;;  %v621_v7 = vadd.f32 %v620_v6, %v614_v60 }
0x113c   :  { %v617_v63 = vpop.f32.mrb[14].mxu0 }
0x113d   :  { %v637_v2 = vrot.slane %v629_v61, %v969_v10  ;;  %v845_v3 = vpop.f32.mrb[15].mxu0  ;;  %v784_v8 = vmul.f32 -1.442695, %v621_v7 }
0x113f   :  { %638 = vrot.lane.b32.xlu1 %v637_v2, %s911_s22  ;;  %896 = vpow2.f32 %v784_v8 }
0x1149   :  { %v897_v9 = vpop.eup %896 }
0x114a   :  { %v625_v12 = vadd.f32 1.0, %v897_v9 }
0x114c   :  { %898 = vrcp.f32 %v625_v12 }
0x1156   :  { %v899_v13 = vpop.eup %898 }
0x1157   :  { %v648_v22 = vsub.f32 1.0, %v899_v13  ;;  %v654_v24 = vmul.f32 %v899_v13, %v569_v57 }
0x11b1   :  { %v639_v14 = vpop.permute.xlu1 %638 }
0x11b2   :  { %v641_v15 = vmul.f32 %v899_v13, %v639_v14 }
0x11b4   :  { %643 = vrot.lane.b32.xlu0 %v641_v15, %s912_s1 }
0x1226   :  { %v644_v17 = vpop.permute.xlu0 %643 }
0x1227   :  { %v646_v19 = vadd.f32 %v644_v17, %v628_v16 }
0x1229   :  { %900 = vtanh.f32 %v646_v19 }
0x1233   :  { %v901_v21 = vpop.eup %900 }
0x1234   :  { %650 = vrot.lane.b32.xlu1 %v901_v21, %s913_s3 }
0x12a6   :  { %v651_v23 = vpop.permute.xlu1 %650 }
0x12a7   :  { %v653_v25 = vmul.f32 %v651_v23, %v648_v22 }
0x12a9   :  { %v655_v26 = vadd.f32 %v654_v24, %v653_v25 }
0x12ab   :  { %v659_v27 = vpack.c.bf16 %v655_v26, %v655_v26 }
0x12ad   :  { %661 = vrot.lane.b32.xlu0 %v659_v27, %s913_s3 }
0x131f   :  { %v662_v28 = vpop.permute.xlu0 %661 }
0x1320   :  { %849 = vmatmul.mubr.msk.bf16.vlgmr.msra.gmra.mrb[12].mxu1 %vm49_vm2, %v662_v28 }
0x13f3   :  { %v700_v29 = vpop.f32.mrb[12].mxu1 }
0x13f4   :  { %v715_v30 = vadd.f32 %v974_v11, %v700_v29  ;;  %v850_v31 = vpop.f32.mrb[13].mxu1  ;;  %v707_v38 = vadd.f32 %v706_v37, %v700_v29 }
0x13f5   :  { %v703_v32 = vpop.f32.mrb[14].mxu1 }
0x13f6   :  { %v723_v33 = vrot.slane %v715_v30, %v969_v10  ;;  %v851_v34 = vpop.f32.mrb[15].mxu1  ;;  %v787_v39 = vmul.f32 -1.442695, %v707_v38 }
0x13f8   :  { %724 = vrot.lane.b32.xlu1 %v723_v33, %s911_s22  ;;  %902 = vpow2.f32 %v787_v39 }
0x1402   :  { %v903_v40 = vpop.eup %902 }
0x1403   :  { %v711_v41 = vadd.f32 1.0, %v903_v40 }
0x1405   :  { %904 = vrcp.f32 %v711_v41 }
0x140f   :  { %v905_v11 = vpop.eup %904 }
0x1410   :  { %v734_v20 = vsub.f32 1.0, %v905_v11  ;;  %v740_v47 = vmul.f32 %v905_v11, %v655_v26 }
0x146a   :  { %v725_v42 = vpop.permute.xlu1 %724 }
0x146b   :  { %v727_v1 = vmul.f32 %v905_v11, %v725_v42 }
0x146d   :  { %729 = vrot.lane.b32.xlu0 %v727_v1, %s912_s1 }
0x14df   :  { %v730_v44 = vpop.permute.xlu0 %729 }
0x14e0   :  { %v732_v0 = vadd.f32 %v730_v44, %v714_v43 }
0x14e2   :  { %906 = vtanh.f32 %v732_v0 }
0x14ec   :  { %v907_v45 = vpop.eup %906 }
0x14ed   :  { %736 = vrot.lane.b32.xlu1 %v907_v45, %s913_s3 }
0x155f   :  { %v737_v46 = vpop.permute.xlu1 %736 }
0x1560   :  { %v739_v48 = vmul.f32 %v737_v46, %v734_v20 }
0x1562   :  { %v741_v49 = vadd.f32 %v740_v47, %v739_v48 }
0x1564   :  { %v749_v50 = vrot.slane %v741_v49, %v969_v10 }
0x1566   :  { %750 = vrot.lane.b32.xlu0 %v749_v50, %s913_s3 }
0x15d8   :  { %v751_v51 = vpop.permute.xlu0 %750 }
0x15d9   :  { %754 = vst.msk [vmem:[#allocation2] sm:$0x3] %vm26_vm0, %v751_v51  ;;  %758 = vst.msk [vmem:[%s1110_s5] sm:$0x3] %vm26_vm0, %v751_v51 }

// kernel: encoder_decoder_forward.8
= control target key start
LH: loop header
LB: loop body
LE: loop exit
PB: predicated region body
PF: predicated region fallthrough
CT: control target
= control target key end

     0   :  { %v1112_v1 = vmov 0.0   ;;  %vm29_vm0 = vcmask 123904   ;;  %vm1113_vm1 = vmmov 0   ;;  %s1398_s0 = inlined_call_operand.vmem [shape: bf16[8,2,48], index: 0, kind: input, shape index: {}]   ;;  %s1399_s1 = inlined_call_operand.vmem [shape: f32[2,48], index: 1, kind: input, shape index: {}]   ;;  %s1400_s2 = inlined_call_operand.vmem [shape: bf16[16,48], index: 2, kind: input, shape index: {}]   ;;  %s1401_s3 = inlined_call_operand.vmem [shape: f32[1,48], index: 3, kind: input, shape index: {}]   ;;  %s1402_s4 = inlined_call_operand.vmem [shape: f32[2,16], index: 4, kind: input, shape index: {}]   ;;  %s1403_s5 = inlined_call_operand.vmem [shape: bf16[8,2,16], index: 5, kind: output, shape index: {0}]   ;;  %s1404_s6 = inlined_call_operand.hbm [shape: f32[2,16], index: 6, kind: output, shape index: {1}]  }
   0x1   :  { %v1159_v0 = vld [vmem:[%s1400_s2] sm:$0xff]   ;;  %982 = vmatprep.subr.bf16.mxu0 %v1112_v1  ;;  %988 = vmatprep.subr.bf16.mxu1 %v1112_v1 }
   0x2   :  { %v28_v2 = vld [vmem:[%s1402_s4] sm:$0x3]  ;;  %983 = vmatpush3.bf16.msra.mxu0 %v1159_v0  ;;  %984 = vmatprep.mubr.msk.bf16.mxu0 %vm1113_vm1, %v1112_v1 }
   0x3   :  { %30 = vst.msk [vmem:[#allocation2] sm:$0x3] %vm29_vm0, %v28_v2  ;;  %989 = vmatpush3.bf16.msra.mxu1 %v1159_v0  ;;  %990 = vmatprep.mubr.msk.bf16.mxu1 %vm1113_vm1, %v1112_v1 }
   0x4   :  { %12 = vsyncpa [#allocation4], 0  ;;  %994 = vmatprep.subr.bf16.mxu0 %v1112_v1  ;;  %1000 = vmatprep.subr.bf16.mxu1 %v1112_v1  ;;  %vm52_vm2 = vcmask 130048   ;;  %v1114_v5 = vmov 1983009808   ;;  %v110_v7 = vlaneseq  ;;  %s1115_s25 = smov 96  }
   0x5   :  { %v108_v6 = vunpack.c.l.s4 %v1114_v5  ;;  %v1188_v11 = vld [vmem:[%s1401_s3] ss:$0 sm:$0xff]  ;;  %s1117_s3 = smov 112   ;;  %s1118_s30 = smov 16   ;;  %v938_v49 = vld [vmem:[%s1398_s0 + $0x1] sm:$0x1] }
   0x6   :  { %v1180_v9 = vshrl.u32 %v110_v7, 7  ;;  %v1196_v18 = vld [vmem:[%s1399_s1] sm:$0x3]  ;;  %s1116_s1 = smov 32   ;;  %v166_v50 = vunpack.c.l.bf16 %v938_v49  ;;  %vm162_vm3 = vcmask 122880   ;;  %s1120_s7 = smov [#allocation3]  }
   0x7   :  { %v109_v8 = vunpack.c.0.s8 %v108_v6  ;;  %v43_v19 = vld [vmem:[%s1398_s0] sm:$0x1]  ;;  %v1203_v20 = vadd.f32 %v1188_v11, %v1196_v18  ;;  %s924_s8 = sshll.u32 %s1120_s7, 4  ;;  %s925_s8 = int_to_ptr.vmem [resolvable:$true] %s924_s8 }
   0x8   :  { %v44_v21 = vunpack.c.l.bf16 %v43_v19  ;;  %v220_v59 = vadd.f32 %v166_v50, %v1196_v18  ;;  %p1093_p1 = scmp.lt.s32.totalorder %s925_s8, %s925_s8 }
   0x9   :  { %v1183_v10 = vsub.s32 %v109_v8, %v1180_v9  ;;  %v212_v51 = vadd.f32 %v166_v50, %v1203_v20 }
   0xa   :  { %v42_v3 = vld [vmem:[#allocation2] sm:$0x3]  ;;  %v96_v22 = vadd.f32 %v44_v21, %v1203_v20  ;;  %v104_v30 = vadd.f32 %v44_v21, %v1196_v18 }
   0xb   :  { %v45_v4 = vpack.c.bf16 %v42_v3, %v42_v3  ;;  %v137_v34 = vrot.slane %v42_v3, %v1183_v10 }
   0xd   :  { %985 = vmatmul.mubr.msk.bf16.vlgmr.msra.gmra.mrb[0].mxu0 %vm52_vm2, %v45_v4 }
   0xe   :  { %995 = vmatpush3.bf16.msra.mxu0 %v1159_v0  ;;  %996 = vmatprep.mubr.msk.bf16.mxu0 %vm1113_vm1, %v1112_v1 }
   0xf   :  { %1006 = vmatprep.subr.bf16.mxu0 %v1112_v1 }
  0xe0   :  { %v90_v12 = vpop.f32.mrb[0].mxu0 }
  0xe1   :  { %v105_v13 = vadd.f32 %v1188_v11, %v90_v12  ;;  %v986_v14 = vpop.f32.mrb[1].mxu0  ;;  %v97_v23 = vadd.f32 %v96_v22, %v90_v12 }
  0xe2   :  { %v93_v15 = vpop.f32.mrb[2].mxu0 }
  0xe3   :  { %v987_v16 = vpop.f32.mrb[3].mxu0  ;;  %v113_v17 = vrot.slane %v105_v13, %v1183_v10  ;;  %v937_v24 = vmul.f32 -1.442695, %v97_v23 }
  0xe5   :  { %114 = vrot.lane.b32.xlu0 %v113_v17, %s1115_s25  ;;  %1040 = vpow2.f32 %v937_v24  ;;  %v942_v17 = vld [vmem:[%s1398_s0 + $0x2] sm:$0x1] }
  0xe6   :  { %v271_v19 = vunpack.c.l.bf16 %v942_v17 }
  0xe8   :  { %v317_v21 = vadd.f32 %v271_v19, %v1203_v20 }
  0xef   :  { %v1041_v25 = vpop.eup %1040 }
  0xf0   :  { %v101_v26 = vadd.f32 1.0, %v1041_v25 }
  0xf2   :  { %1042 = vrcp.f32 %v101_v26 }
  0xfc   :  { %v1043_v27 = vpop.eup %1042 }
  0xfd   :  { %v124_v36 = vsub.f32 1.0, %v1043_v27 }
 0x157   :  { %v115_v28 = vpop.permute.xlu0 %114 }
 0x158   :  { %v117_v29 = vmul.f32 %v1043_v27, %v115_v28 }
 0x15a   :  { %119 = vrot.lane.b32.xlu0 %v117_v29, %s1116_s1  ;;  %v325_v29 = vadd.f32 %v271_v19, %v1196_v18 }
 0x1cc   :  { %v120_v31 = vpop.permute.xlu0 %119 }
 0x1cd   :  { %v122_v32 = vadd.f32 %v120_v31, %v104_v30 }
 0x1cf   :  { %1044 = vtanh.f32 %v122_v32 }
 0x1d9   :  { %v1045_v33 = vpop.eup %1044 }
 0x1da   :  { %126 = vrot.lane.b32.xlu1 %v1045_v33, %s1117_s3 }
 0x1de   :  { %138 = vrot.lane.b32.xlu1 %v137_v34, %s1118_s30 }
 0x24c   :  { %v127_v35 = vpop.permute.xlu1 %126 }
 0x24d   :  { %v129_v38 = vmul.f32 %v127_v35, %v124_v36 }
 0x250   :  { %v139_v37 = vpop.permute.xlu1 %138 }
 0x251   :  { %v141_v39 = vmul.f32 %v1043_v27, %v139_v37 }
 0x253   :  { %v142_v40 = vadd.f32 %v141_v39, %v129_v38 }
 0x255   :  { %v1210_v41 = vpack.c.bf16 %v142_v40, %v142_v40 }
 0x257   :  { %167 = vrot.lane.b32.xlu0 %v1210_v41, %s1117_s3 }
 0x2c9   :  { %v168_v42 = vpop.permute.xlu0 %167 }
 0x2ca   :  { %991 = vmatmul.mubr.msk.bf16.vlgmr.msra.gmra.mrb[0].mxu1 %vm52_vm2, %v168_v42 }
 0x2cb   :  { %1001 = vmatpush3.bf16.msra.mxu1 %v1159_v0  ;;  %1002 = vmatprep.mubr.msk.bf16.mxu1 %vm1113_vm1, %v1112_v1 }
 0x2cc   :  { %1012 = vmatprep.subr.bf16.mxu1 %v1112_v1 }
 0x39d   :  { %v206_v43 = vpop.f32.mrb[0].mxu1 }
 0x39e   :  { %v221_v44 = vadd.f32 %v1188_v11, %v206_v43  ;;  %v992_v45 = vpop.f32.mrb[1].mxu1  ;;  %v213_v52 = vadd.f32 %v212_v51, %v206_v43 }
 0x39f   :  { %v209_v46 = vpop.f32.mrb[2].mxu1 }
 0x3a0   :  { %v229_v47 = vrot.slane %v221_v44, %v1183_v10  ;;  %v993_v48 = vpop.f32.mrb[3].mxu1  ;;  %v940_v53 = vmul.f32 -1.442695, %v213_v52 }
 0x3a2   :  { %230 = vrot.lane.b32.xlu1 %v229_v47, %s1115_s25  ;;  %1046 = vpow2.f32 %v940_v53  ;;  %v946_v47 = vld [vmem:[%s1398_s0 + $0x3] sm:$0x1] }
 0x3a3   :  { %v376_v48 = vunpack.c.l.bf16 %v946_v47  ;;  %v954_v47 = vld [vmem:[%s1398_s0 + $0x5] sm:$0x1] }
 0x3a5   :  { %v422_v49 = vadd.f32 %v376_v48, %v1203_v20 }
 0x3ac   :  { %v1047_v54 = vpop.eup %1046 }
 0x3ad   :  { %v217_v55 = vadd.f32 1.0, %v1047_v54 }
 0x3af   :  { %1048 = vrcp.f32 %v217_v55 }
 0x3b9   :  { %v1049_v56 = vpop.eup %1048 }
 0x3ba   :  { %v240_v63 = vsub.f32 1.0, %v1049_v56  ;;  %v246_v3 = vmul.f32 %v1049_v56, %v142_v40 }
 0x414   :  { %v231_v57 = vpop.permute.xlu1 %230 }
 0x415   :  { %v233_v58 = vmul.f32 %v1049_v56, %v231_v57  ;;  %v430_v57 = vadd.f32 %v376_v48, %v1196_v18  ;;  %v586_v48 = vunpack.c.l.bf16 %v954_v47  ;;  %v962_v47 = vld [vmem:[%s1398_s0 + $0x7] sm:$0x1] }
 0x417   :  { %235 = vrot.lane.b32.xlu0 %v233_v58, %s1116_s1 }
 0x489   :  { %v236_v60 = vpop.permute.xlu0 %235 }
 0x48a   :  { %v238_v61 = vadd.f32 %v236_v60, %v220_v59 }
 0x48c   :  { %1050 = vtanh.f32 %v238_v61 }
 0x496   :  { %v1051_v62 = vpop.eup %1050 }
 0x497   :  { %242 = vrot.lane.b32.xlu1 %v1051_v62, %s1117_s3 }
 0x509   :  { %v243_v2 = vpop.permute.xlu1 %242 }
 0x50a   :  { %v245_v4 = vmul.f32 %v243_v2, %v240_v63 }
 0x50c   :  { %v247_v5 = vadd.f32 %v246_v3, %v245_v4 }
 0x50e   :  { %v1229_v6 = vpack.c.bf16 %v247_v5, %v247_v5 }
 0x510   :  { %272 = vrot.lane.b32.xlu0 %v1229_v6, %s1117_s3 }
 0x582   :  { %v273_v7 = vpop.permute.xlu0 %272 }
 0x583   :  { %997 = vmatmul.mubr.msk.bf16.vlgmr.msra.gmra.mrb[4].mxu0 %vm52_vm2, %v273_v7 }
 0x584   :  { %1007 = vmatpush3.bf16.msra.mxu0 %v1159_v0  ;;  %1008 = vmatprep.mubr.msk.bf16.mxu0 %vm1113_vm1, %v1112_v1 }
 0x585   :  { %1018 = vmatprep.subr.bf16.mxu0 %v1112_v1 }
 0x656   :  { %v311_v8 = vpop.f32.mrb[4].mxu0 }
 0x657   :  { %v326_v12 = vadd.f32 %v1188_v11, %v311_v8  ;;  %v998_v13 = vpop.f32.mrb[5].mxu0  ;;  %v318_v22 = vadd.f32 %v317_v21, %v311_v8 }
 0x658   :  { %v314_v14 = vpop.f32.mrb[6].mxu0 }
 0x659   :  { %v334_v15 = vrot.slane %v326_v12, %v1183_v10  ;;  %v999_v16 = vpop.f32.mrb[7].mxu0  ;;  %v944_v23 = vmul.f32 -1.442695, %v318_v22 }
 0x65a   :  { %v950_v16 = vld [vmem:[%s1398_s0 + $0x4] sm:$0x1] }
 0x65b   :  { %335 = vrot.lane.b32.xlu1 %v334_v15, %s1115_s25  ;;  %1052 = vpow2.f32 %v944_v23  ;;  %v481_v17 = vunpack.c.l.bf16 %v950_v16 }
 0x65d   :  { %v527_v19 = vadd.f32 %v481_v17, %v1203_v20 }
 0x665   :  { %v1053_v24 = vpop.eup %1052 }
 0x666   :  { %v322_v25 = vadd.f32 1.0, %v1053_v24 }
 0x668   :  { %1054 = vrcp.f32 %v322_v25 }
 0x672   :  { %v1055_v26 = vpop.eup %1054 }
 0x673   :  { %v345_v33 = vsub.f32 1.0, %v1055_v26  ;;  %v351_v35 = vmul.f32 %v1055_v26, %v247_v5 }
 0x6cd   :  { %v336_v27 = vpop.permute.xlu1 %335 }
 0x6ce   :  { %v338_v28 = vmul.f32 %v1055_v26, %v336_v27 }
 0x6d0   :  { %340 = vrot.lane.b32.xlu0 %v338_v28, %s1116_s1  ;;  %v535_v28 = vadd.f32 %v481_v17, %v1196_v18 }
 0x742   :  { %v341_v30 = vpop.permute.xlu0 %340 }
 0x743   :  { %v343_v31 = vadd.f32 %v341_v30, %v325_v29 }
 0x745   :  { %1056 = vtanh.f32 %v343_v31 }
 0x74f   :  { %v1057_v32 = vpop.eup %1056 }
 0x750   :  { %347 = vrot.lane.b32.xlu1 %v1057_v32, %s1117_s3 }
 0x7c2   :  { %v348_v34 = vpop.permute.xlu1 %347 }
 0x7c3   :  { %v350_v36 = vmul.f32 %v348_v34, %v345_v33 }
 0x7c5   :  { %v352_v37 = vadd.f32 %v351_v35, %v350_v36 }
 0x7c7   :  { %v1248_v38 = vpack.c.bf16 %v352_v37, %v352_v37 }
 0x7c9   :  { %377 = vrot.lane.b32.xlu0 %v1248_v38, %s1117_s3 }
 0x83b   :  { %v378_v39 = vpop.permute.xlu0 %377 }
 0x83c   :  { %1003 = vmatmul.mubr.msk.bf16.vlgmr.msra.gmra.mrb[4].mxu1 %vm52_vm2, %v378_v39 }
 0x83d   :  { %1013 = vmatpush3.bf16.msra.mxu1 %v1159_v0  ;;  %1014 = vmatprep.mubr.msk.bf16.mxu1 %vm1113_vm1, %v1112_v1 }
 0x83e   :  { %1024 = vmatprep.subr.bf16.mxu1 %v1112_v1 }
 0x90f   :  { %v416_v40 = vpop.f32.mrb[4].mxu1 }
 0x910   :  { %v431_v42 = vadd.f32 %v1188_v11, %v416_v40  ;;  %v1004_v43 = vpop.f32.mrb[5].mxu1  ;;  %v423_v50 = vadd.f32 %v422_v49, %v416_v40 }
 0x911   :  { %v419_v44 = vpop.f32.mrb[6].mxu1 }
 0x912   :  { %v439_v45 = vrot.slane %v431_v42, %v1183_v10  ;;  %v1005_v46 = vpop.f32.mrb[7].mxu1  ;;  %v948_v51 = vmul.f32 -1.442695, %v423_v50 }
 0x914   :  { %440 = vrot.lane.b32.xlu1 %v439_v45, %s1115_s25  ;;  %1058 = vpow2.f32 %v948_v51 }
 0x91e   :  { %v1059_v52 = vpop.eup %1058 }
 0x91f   :  { %v427_v53 = vadd.f32 1.0, %v1059_v52 }
 0x921   :  { %1060 = vrcp.f32 %v427_v53 }
 0x92b   :  { %v1061_v54 = vpop.eup %1060 }
 0x92c   :  { %v450_v61 = vsub.f32 1.0, %v1061_v54  ;;  %v456_v63 = vmul.f32 %v1061_v54, %v352_v37 }
 0x986   :  { %v441_v55 = vpop.permute.xlu1 %440 }
 0x987   :  { %v443_v56 = vmul.f32 %v1061_v54, %v441_v55  ;;  %v640_v55 = vadd.f32 %v586_v48, %v1196_v18 }
 0x989   :  { %445 = vrot.lane.b32.xlu0 %v443_v56, %s1116_s1 }
 0x9fb   :  { %v446_v58 = vpop.permute.xlu0 %445 }
 0x9fc   :  { %v448_v59 = vadd.f32 %v446_v58, %v430_v57 }
 0x9fe   :  { %1062 = vtanh.f32 %v448_v59 }
 0xa08   :  { %v1063_v60 = vpop.eup %1062 }
 0xa09   :  { %452 = vrot.lane.b32.xlu1 %v1063_v60, %s1117_s3 }
 0xa7b   :  { %v453_v62 = vpop.permute.xlu1 %452 }
 0xa7c   :  { %v455_v2 = vmul.f32 %v453_v62, %v450_v61 }
 0xa7e   :  { %v457_v3 = vadd.f32 %v456_v63, %v455_v2 }
 0xa80   :  { %v1267_v4 = vpack.c.bf16 %v457_v3, %v457_v3 }
 0xa82   :  { %482 = vrot.lane.b32.xlu0 %v1267_v4, %s1117_s3 }
 0xaf4   :  { %v483_v5 = vpop.permute.xlu0 %482 }
 0xaf5   :  { %1009 = vmatmul.mubr.msk.bf16.vlgmr.msra.gmra.mrb[8].mxu0 %vm52_vm2, %v483_v5 }
 0xaf6   :  { %1019 = vmatpush3.bf16.msra.mxu0 %v1159_v0  ;;  %1020 = vmatprep.mubr.msk.bf16.mxu0 %vm1113_vm1, %v1112_v1 }
 0xbc8   :  { %v521_v7 = vpop.f32.mrb[8].mxu0 }
 0xbc9   :  { %v536_v8 = vadd.f32 %v1188_v11, %v521_v7  ;;  %v1010_v12 = vpop.f32.mrb[9].mxu0  ;;  %v528_v21 = vadd.f32 %v527_v19, %v521_v7 }
 0xbca   :  { %v524_v13 = vpop.f32.mrb[10].mxu0 }
 0xbcb   :  { %v544_v14 = vrot.slane %v536_v8, %v1183_v10  ;;  %v1011_v15 = vpop.f32.mrb[11].mxu0  ;;  %v952_v22 = vmul.f32 -1.442695, %v528_v21 }
 0xbcc   :  { %v958_v15 = vld [vmem:[%s1398_s0 + $0x6] sm:$0x1] }
 0xbcd   :  { %545 = vrot.lane.b32.xlu1 %v544_v14, %s1115_s25  ;;  %1064 = vpow2.f32 %v952_v22  ;;  %v691_v16 = vunpack.c.l.bf16 %v958_v15 }
 0xbcf   :  { %v737_v17 = vadd.f32 %v691_v16, %v1203_v20 }
 0xbd7   :  { %v1065_v23 = vpop.eup %1064 }
 0xbd8   :  { %v532_v24 = vadd.f32 1.0, %v1065_v23 }
 0xbda   :  { %1066 = vrcp.f32 %v532_v24 }
 0xbe4   :  { %v1067_v25 = vpop.eup %1066 }
 0xbe5   :  { %v555_v32 = vsub.f32 1.0, %v1067_v25  ;;  %v561_v34 = vmul.f32 %v1067_v25, %v457_v3 }
 0xc3f   :  { %v546_v26 = vpop.permute.xlu1 %545 }
 0xc40   :  { %v548_v27 = vmul.f32 %v1067_v25, %v546_v26 }
 0xc42   :  { %550 = vrot.lane.b32.xlu0 %v548_v27, %s1116_s1  ;;  %v745_v27 = vadd.f32 %v691_v16, %v1196_v18 }
 0xcb4   :  { %v551_v29 = vpop.permute.xlu0 %550 }
 0xcb5   :  { %v553_v30 = vadd.f32 %v551_v29, %v535_v28 }
 0xcb7   :  { %1068 = vtanh.f32 %v553_v30 }
 0xcc1   :  { %v1069_v31 = vpop.eup %1068 }
 0xcc2   :  { %557 = vrot.lane.b32.xlu1 %v1069_v31, %s1117_s3 }
 0xd34   :  { %v558_v33 = vpop.permute.xlu1 %557 }
 0xd35   :  { %v560_v35 = vmul.f32 %v558_v33, %v555_v32 }
 0xd37   :  { %v562_v36 = vadd.f32 %v561_v34, %v560_v35 }
 0xd39   :  { %v1285_v37 = vpack.c.bf16 %v562_v36, %v562_v36 }
 0xd3b   :  { %587 = vrot.lane.b32.xlu0 %v1285_v37, %s1117_s3 }
 0xdad   :  { %v588_v39 = vpop.permute.xlu0 %587 }
 0xdae   :  { %1015 = vmatmul.mubr.msk.bf16.vlgmr.msra.gmra.mrb[8].mxu1 %vm52_vm2, %v588_v39 }
 0xdaf   :  { %1025 = vmatpush3.bf16.msra.mxu1 %v1159_v0  ;;  %1026 = vmatprep.mubr.msk.bf16.mxu1 %vm1113_vm1, %v1112_v1  ;;  %v632_v0 = vadd.f32 %v586_v48, %v1203_v20  ;;  %v796_v48 = vunpack.c.l.bf16 %v962_v47 }
 0xe81   :  { %v626_v40 = vpop.f32.mrb[8].mxu1 }
 0xe82   :  { %v641_v42 = vadd.f32 %v1188_v11, %v626_v40  ;;  %v1016_v43 = vpop.f32.mrb[9].mxu1  ;;  %v633_v49 = vadd.f32 %v632_v0, %v626_v40  ;;  %v842_v0 = vadd.f32 %v796_v48, %v1203_v20 }
 0xe83   :  { %v629_v44 = vpop.f32.mrb[10].mxu1 }
 0xe84   :  { %v649_v45 = vrot.slane %v641_v42, %v1183_v10  ;;  %v1017_v46 = vpop.f32.mrb[11].mxu1  ;;  %v956_v50 = vmul.f32 -1.442695, %v633_v49 }
 0xe86   :  { %650 = vrot.lane.b32.xlu1 %v649_v45, %s1115_s25  ;;  %1070 = vpow2.f32 %v956_v50 }
 0xe90   :  { %v1071_v1 = vpop.eup %1070 }
 0xe91   :  { %v637_v51 = vadd.f32 1.0, %v1071_v1 }
 0xe93   :  { %1072 = vrcp.f32 %v637_v51 }
 0xe9d   :  { %v1073_v52 = vpop.eup %1072 }
 0xe9e   :  { %v660_v59 = vsub.f32 1.0, %v1073_v52  ;;  %v666_v61 = vmul.f32 %v1073_v52, %v562_v36 }
 0xef8   :  { %v651_v53 = vpop.permute.xlu1 %650 }
 0xef9   :  { %v653_v54 = vmul.f32 %v1073_v52, %v651_v53 }
 0xefb   :  { %655 = vrot.lane.b32.xlu0 %v653_v54, %s1116_s1 }
 0xf6d   :  { %v656_v56 = vpop.permute.xlu0 %655 }
 0xf6e   :  { %v658_v57 = vadd.f32 %v656_v56, %v640_v55 }
 0xf70   :  { %1074 = vtanh.f32 %v658_v57 }
 0xf7a   :  { %v1075_v58 = vpop.eup %1074 }
 0xf7b   :  { %662 = vrot.lane.b32.xlu1 %v1075_v58, %s1117_s3 }
 0xfed   :  { %v663_v60 = vpop.permute.xlu1 %662 }
 0xfee   :  { %v665_v62 = vmul.f32 %v663_v60, %v660_v59 }
 0xff0   :  { %v667_v63 = vadd.f32 %v666_v61, %v665_v62 }
 0xff2   :  { %v1303_v2 = vpack.c.bf16 %v667_v63, %v667_v63 }
 0xff4   :  { %692 = vrot.lane.b32.xlu0 %v1303_v2, %s1117_s3 }
0x1066   :  { %v693_v3 = vpop.permute.xlu0 %692 }
0x1067   :  { %1021 = vmatmul.mubr.msk.bf16.vlgmr.msra.gmra.mrb[12].mxu0 %vm52_vm2, %v693_v3 }
0x113a   :  { %v731_v5 = vpop.f32.mrb[12].mxu0 }
0x113b   :  { %v746_v7 = vadd.f32 %v1188_v11, %v731_v5  ;;  %v1022_v8 = vpop.f32.mrb[13].mxu0  ;;  %v738_v19 = vadd.f32 %v737_v17, %v731_v5 }
0x113c   :  { %v734_v12 = vpop.f32.mrb[14].mxu0 }
0x113d   :  { %v754_v13 = vrot.slane %v746_v7, %v1183_v10  ;;  %v1023_v14 = vpop.f32.mrb[15].mxu0  ;;  %v960_v21 = vmul.f32 -1.442695, %v738_v19 }
0x113f   :  { %755 = vrot.lane.b32.xlu1 %v754_v13, %s1115_s25  ;;  %1076 = vpow2.f32 %v960_v21 }
0x1149   :  { %v1077_v22 = vpop.eup %1076 }
0x114a   :  { %v742_v23 = vadd.f32 1.0, %v1077_v22 }
0x114c   :  { %1078 = vrcp.f32 %v742_v23 }
0x1156   :  { %v1079_v24 = vpop.eup %1078 }
0x1157   :  { %v765_v31 = vsub.f32 1.0, %v1079_v24  ;;  %v771_v33 = vmul.f32 %v1079_v24, %v667_v63 }
0x11b1   :  { %v756_v25 = vpop.permute.xlu1 %755 }
0x11b2   :  { %v758_v26 = vmul.f32 %v1079_v24, %v756_v25 }
0x11b4   :  { %760 = vrot.lane.b32.xlu0 %v758_v26, %s1116_s1 }
0x1226   :  { %v761_v28 = vpop.permute.xlu0 %760 }
0x1227   :  { %v763_v29 = vadd.f32 %v761_v28, %v745_v27 }
0x1229   :  { %1080 = vtanh.f32 %v763_v29 }
0x1233   :  { %v1081_v30 = vpop.eup %1080 }
0x1234   :  { %767 = vrot.lane.b32.xlu1 %v1081_v30, %s1117_s3 }
0x12a6   :  { %v768_v32 = vpop.permute.xlu1 %767 }
0x12a7   :  { %v770_v34 = vmul.f32 %v768_v32, %v765_v31 }
0x12a9   :  { %v1318_v35 = vadd.f32 %v771_v33, %v770_v34 }
0x12ab   :  { %v773_v36 = vpack.c.bf16 %v1318_v35, %v1318_v35 }
0x12ad   :  { %797 = vrot.lane.b32.xlu0 %v773_v36, %s1117_s3 }
0x131f   :  { %v798_v39 = vpop.permute.xlu0 %797 }
0x1320   :  { %1027 = vmatmul.mubr.msk.bf16.vlgmr.msra.gmra.mrb[12].mxu1 %vm52_vm2, %v798_v39 }
0x13f3   :  { %v836_v40 = vpop.f32.mrb[12].mxu1 }
0x13f4   :  { %v851_v42 = vadd.f32 %v1188_v11, %v836_v40  ;;  %v1028_v43 = vpop.f32.mrb[13].mxu1  ;;  %v843_v49 = vadd.f32 %v842_v0, %v836_v40  ;;  %v1119_v11 = vmov 1966171168  }
0x13f5   :  { %v839_v44 = vpop.f32.mrb[14].mxu1  ;;  %v146_v52 = vunpack.c.l.s4 %v1119_v11 }
0x13f6   :  { %v859_v45 = vrot.slane %v851_v42, %v1183_v10  ;;  %v1029_v46 = vpop.f32.mrb[15].mxu1  ;;  %v964_v50 = vmul.f32 -1.442695, %v843_v49 }
0x13f7   :  { %v147_v53 = vunpack.c.0.s8 %v146_v52 }
0x13f8   :  { %860 = vrot.lane.b32.xlu1 %v859_v45, %s1115_s25  ;;  %1082 = vpow2.f32 %v964_v50 }
0x13f9   :  { %v150_v54 = vsub.s32 %v147_v53, %v1180_v9  ;;  %v850_v9 = vadd.f32 %v796_v48, %v1196_v18 }
0x13fb   :  { %v256_v58 = vrot.slane %v1229_v6, %v150_v54  ;;  %v466_v20 = vrot.slane %v1267_v4, %v150_v54  ;;  %v676_v61 = vrot.slane %v1303_v2, %v150_v54  ;;  %v151_v5 = vrot.slane %v1210_v41, %v150_v54 }
0x13fc   :  { %v361_v8 = vrot.slane %v1248_v38, %v150_v54  ;;  %v571_v13 = vrot.slane %v1285_v37, %v150_v54  ;;  %v781_v41 = vrot.slane %v773_v36, %v150_v54 }
0x13fd   :  { %v263_v59 = vrot.slane %v256_v58, %v150_v54  ;;  %v473_v60 = vrot.slane %v466_v20, %v150_v54  ;;  %v683_v62 = vrot.slane %v676_v61, %v150_v54  ;;  %v158_v7 = vrot.slane %v151_v5, %v150_v54 }
0x13fe   :  { %v368_v12 = vrot.slane %v361_v8, %v150_v54  ;;  %v578_v14 = vrot.slane %v571_v13, %v150_v54  ;;  %v788_v15 = vrot.slane %v781_v41, %v150_v54 }
0x1402   :  { %v1083_v1 = vpop.eup %1082 }
0x1403   :  { %v847_v51 = vadd.f32 1.0, %v1083_v1 }
0x1405   :  { %1084 = vrcp.f32 %v847_v51 }
0x140f   :  { %v1085_v55 = vpop.eup %1084 }
0x1410   :  { %v870_v16 = vsub.f32 1.0, %v1085_v55  ;;  %v876_v19 = vmul.f32 %v1085_v55, %v1318_v35 }
0x146a   :  { %v861_v56 = vpop.permute.xlu1 %860 }
0x146b   :  { %v863_v57 = vmul.f32 %v1085_v55, %v861_v56 }
0x146d   :  { %865 = vrot.lane.b32.xlu0 %v863_v57, %s1116_s1 }
0x1471   :  { %264 = vrot.lane.b32.xlu0 %v263_v59, %s1117_s3 }
0x1475   :  { %474 = vrot.lane.b32.xlu0 %v473_v60, %s1117_s3 }
0x1479   :  { %684 = vrot.lane.b32.xlu0 %v683_v62, %s1117_s3 }
0x14df   :  { %v866_v63 = vpop.permute.xlu0 %865 }
0x14e0   :  { %v868_v3 = vadd.f32 %v866_v63, %v850_v9 }
0x14e2   :  { %1086 = vtanh.f32 %v868_v3 }
0x14e3   :  { %v265_v6 = vpop.permute.xlu0 %264 }
0x14e4   :  { %941 = vst.msk [vmem:[%s1403_s5 + $0x1] sm:$0x1] %vm162_vm3, %v265_v6 }
0x14e7   :  { %v475_v4 = vpop.permute.xlu0 %474 }
0x14e8   :  { %949 = vst.msk [vmem:[%s1403_s5 + $0x3] sm:$0x1] %vm162_vm3, %v475_v4 }
0x14eb   :  { %v685_v2 = vpop.permute.xlu0 %684 }
0x14ec   :  { %v1087_v18 = vpop.eup %1086  ;;  %957 = vst.msk [vmem:[%s1403_s5 + $0x5] sm:$0x1] %vm162_vm3, %v685_v2 }
0x14ed   :  { %872 = vrot.lane.b32.xlu1 %v1087_v18, %s1117_s3 }
0x14f1   :  { %159 = vrot.lane.b32.xlu1 %v158_v7, %s1117_s3 }
0x14f5   :  { %369 = vrot.lane.b32.xlu1 %v368_v12, %s1117_s3 }
0x14f9   :  { %579 = vrot.lane.b32.xlu1 %v578_v14, %s1117_s3 }
0x14fd   :  { %789 = vrot.lane.b32.xlu1 %v788_v15, %s1117_s3 }
0x155f   :  { %v873_v17 = vpop.permute.xlu1 %872 }
0x1560   :  { %v875_v21 = vmul.f32 %v873_v17, %v870_v16 }
0x1562   :  { %v877_v38 = vadd.f32 %v876_v19, %v875_v21 }
0x1563   :  { %v160_v22 = vpop.permute.xlu1 %159 }
0x1564   :  { %v878_v23 = vpack.c.bf16 %v877_v38, %v877_v38  ;;  %163 = vst.msk [vmem:[%s1403_s5] sm:$0x1] %vm162_vm3, %v160_v22  ;;  %v906_v37 = vrot.slane %v877_v38, %v1183_v10 }
0x1566   :  { %907 = vrot.lane.b32.xlu0 %v906_v37, %s1117_s3  ;;  %v886_v24 = vrot.slane %v878_v23, %v150_v54 }
0x1567   :  { %v370_v25 = vpop.permute.xlu1 %369 }
0x1568   :  { %945 = vst.msk [vmem:[%s1403_s5 + $0x2] sm:$0x1] %vm162_vm3, %v370_v25  ;;  %v893_v26 = vrot.slane %v886_v24, %v150_v54 }
0x156a   :  { %894 = vrot.lane.b32.xlu0 %v893_v26, %s1117_s3  ;;  %s1088_s3 = scalar_lea.vmem %s925_s8, 32 }
0x156b   :  { %v580_v27 = vpop.permute.xlu1 %579  ;;  %p1089_p0 = scmp.ne.s32.totalorder %s925_s8, %s1088_s3  ;;  %p1094_p2 = scmp.lt.s32.totalorder %s1088_s3, %s1088_s3 }
0x156c   :  { %953 = vst.msk [vmem:[%s1403_s5 + $0x4] sm:$0x1] %vm162_vm3, %v580_v27 }
0x156d   :  { %p1095_p3 = por %p1094_p2, %p1093_p1 }
0x156f   :  { %v790_v28 = vpop.permute.xlu1 %789  ;;  %p1096_p4 = pnand %p1095_p3, %p1089_p0 }
0x1570   :  { %961 = vst.msk [vmem:[%s1403_s5 + $0x6] sm:$0x1] %vm162_vm3, %v790_v28 }
0x15d8   :  { %v908_v10 = vpop.permute.xlu0 %907 }
0x15d9   :  { %911 = vst.msk [vmem:[#allocation2] sm:$0x3] %vm29_vm0, %v908_v10  ;;  %915 = vst.msk [vmem:[#allocation3] sm:$0x3] %vm29_vm0, %v908_v10 }
0x15da   :  { %1099 = shalt.err (!%p1096_p4)
}
0x15db   :  { %s1100_s11 = scalar_lea.hbm %s1404_s6, 32 }
0x15dc   :  { %p1101_p5 = scmp.ne.s32.totalorder %s1404_s6, %s1100_s11  ;;  %p1104_p6 = scmp.lt.u32.totalorder %s1100_s11, %s1404_s6 }
0x15de   :  { %p1106_p7 = pnand %p1104_p6, %p1101_p5 }
0x15e0   :  { %1109 = shalt.err (!%p1106_p7)
}
0x15e1   :  { %927 = dma.vmem_to_hbm [thread:$0]  %s925_s8, 32, %s1404_s6, [#allocation4]   ;;  %v895_v29 = vpop.permute.xlu0 %894 }
0x15e2   :  { %965 = vst.msk [vmem:[%s1403_s5 + $0x7] sm:$0x1] %vm162_vm3, %v895_v29 }
0x15e3   :  { %1110 = dma.done.wait [#allocation4], 32  }
0x15e4   :  { %1111 = vsyncadd [#allocation4], 4294967264 }
0x15e5   :  { %933 = vsyncpa [#allocation4], 1 }

</bundles_post_ra>
